<compile_context>
chip_gen: v5e
topology: v5e:2x2
jax: 0.10.0
libtpu: 0.0.40
codegen_flags: <defaults>
</compile_context>

<pallas_src>
import jax
import jax.numpy as jnp
from jax import lax
from jax.experimental import pallas as pl
from jax.experimental.pallas import tpu as pltpu


def _make_fused_kernel(cin, feat, cout, Wp, S, G, L):
    """Fused 3-layer 3x3 'same' conv generator, one batch element per grid step.

    Refs (batch dim squeezed by BlockSpec):
      x_ref  : (cin, L)        padded input, flattened padded spatial + guards
      w*_ref : (Cout_l, 9*Cin_l)   transposed per-layer weights
      b*_ref : (Cout_l, 1)
      mask   : (1, S)          1.0 at valid interior pixels, 0.0 at pad border
      o_ref  : (cout, S)       layer-3 output over padded spatial (border junk
                               is stripped by the wrapper)
    Scratch:
      h1_ref, h2_ref : (feat, L)   intermediate activations (+ zero guards)
      patch_ref      : (9*feat, S) in-VMEM im2col buffer (reused per layer)
    """
    # Tap (dy, dx) of output position s reads buffer index s + dy*Wp + dx
    # (buffers carry a G = Wp+1 guard band on each side of the S-long payload).
    offsets = [dy * Wp + dx for dy in range(3) for dx in range(3)]

    def im2col(src_ref, c, patch_ref):
        for k, off in enumerate(offsets):
            patch_ref[k * c : (k + 1) * c, :] = src_ref[:, off : off + S]

    def kernel(x_ref, w1_ref, b1_ref, w2_ref, b2_ref, w3_ref, b3_ref, mask_ref,
               o_ref, h1_ref, h2_ref, patch_ref):
        mask = mask_ref[...]                              # (1, S)
        guard = jnp.zeros((feat, G), jnp.float32)

        # ---- layer 1: cin -> feat, ReLU (single matmul, K = 9*cin) ----
        im2col(x_ref, cin, patch_ref)
        a1 = jnp.dot(w1_ref[...], patch_ref[: 9 * cin, :],
                     preferred_element_type=jnp.float32) + b1_ref[...]
        h1_ref[:, :G] = guard
        h1_ref[:, G + S :] = guard
        h1_ref[:, G : G + S] = jnp.maximum(a1, 0.0) * mask

        # ---- layer 2: feat -> feat, ReLU (single matmul, K = 9*feat) ----
        im2col(h1_ref, feat, patch_ref)
        a2 = jnp.dot(w2_ref[...], patch_ref[...],
                     preferred_element_type=jnp.float32) + b2_ref[...]
        h2_ref[:, :G] = guard
        h2_ref[:, G + S :] = guard
        h2_ref[:, G : G + S] = jnp.maximum(a2, 0.0) * mask

        # ---- layer 3: feat -> cout, tanh ----
        im2col(h2_ref, feat, patch_ref)
        a3 = jnp.dot(w3_ref[...], patch_ref[...],
                     preferred_element_type=jnp.float32) + b3_ref[...]
        o_ref[...] = jnp.tanh(a3).astype(o_ref.dtype)

    return kernel


@jax.jit
def gan_forward(params, x_nchw):
    """GAN.forward(x) == net_G(x); NCHW in / NCHW out like the PyTorch module."""
    N, Cin, H, W = x_nchw.shape
    feat = params["w1"].shape[-1]
    Cout = params["w3"].shape[-1]
    Hp, Wp = H + 2, W + 2
    S = Hp * Wp                     # flattened padded spatial (lane axis)
    G = Wp + 1                      # guard band so all 9 tap slices stay in-bounds
    L = S + 2 * G

    # ---- plain-JAX glue (done once, ~1.3x input bytes; no 9x im2col) ----
    xp = jnp.pad(x_nchw, ((0, 0), (0, 0), (1, 1), (1, 1)))        # zero 'same' pad
    xf = jnp.pad(xp.reshape(N, Cin, S), ((0, 0), (0, 0), (G, G)))  # (N, Cin, L)

    # interior mask over flattened padded spatial positions
    yy = jnp.arange(Hp)[:, None]
    xx = jnp.arange(Wp)[None, :]
    mask = ((yy >= 1) & (yy <= H) & (xx >= 1) & (xx <= W))
    mask = mask.astype(jnp.float32).reshape(1, S)

    # channels-major weights: (Cout_layer, 9*Cin_layer); biases as columns
    w1t = params["w1"].reshape(9 * Cin, feat).T
    w2t = params["w2"].reshape(9 * feat, feat).T
    w3t = params["w3"].reshape(9 * feat, Cout).T
    b1 = params["b1"].reshape(feat, 1)
    b2 = params["b2"].reshape(feat, 1)
    b3 = params["b3"].reshape(Cout, 1)

    kernel = _make_fused_kernel(Cin, feat, Cout, Wp, S, G, L)

    flops = 2 * N * S * 9 * (Cin * feat + feat * feat + feat * Cout)
    bytes_accessed = 4 * (xf.size + w1t.size + w2t.size + w3t.size
                          + b1.size + b2.size + b3.size + mask.size
                          + N * Cout * S)

    out_flat = pl.pallas_call(
        kernel,
        out_shape=jax.ShapeDtypeStruct((N, Cout, S), x_nchw.dtype),
        grid=(N,),
        in_specs=[
            pl.BlockSpec((None, Cin, L), lambda n: (n, 0, 0)),
            pl.BlockSpec((feat, 9 * Cin), lambda n: (0, 0)),
            pl.BlockSpec((feat, 1), lambda n: (0, 0)),
            pl.BlockSpec((feat, 9 * feat), lambda n: (0, 0)),
            pl.BlockSpec((feat, 1), lambda n: (0, 0)),
            pl.BlockSpec((Cout, 9 * feat), lambda n: (0, 0)),
            pl.BlockSpec((Cout, 1), lambda n: (0, 0)),
            pl.BlockSpec((1, S), lambda n: (0, 0)),
        ],
        out_specs=pl.BlockSpec((None, Cout, S), lambda n: (n, 0, 0)),
        scratch_shapes=[
            pltpu.VMEM((feat, L), jnp.float32),        # h1
            pltpu.VMEM((feat, L), jnp.float32),        # h2
            pltpu.VMEM((9 * feat, S), jnp.float32),    # im2col patches (reused)
        ],
        compiler_params=pltpu.CompilerParams(
            dimension_semantics=("parallel",),
            vmem_limit_bytes=32 * 1024 * 1024,
        ),
        cost_estimate=pl.CostEstimate(
            flops=flops,
            transcendentals=N * S * Cout,
            bytes_accessed=bytes_accessed,
        ),
    )(xf, w1t, b1, w2t, b2, w3t, b3, mask)

    # strip the padded border -> already NCHW, no transposes needed
    return out_flat.reshape(N, Cout, Hp, Wp)[:, :, 1 : H + 1, 1 : W + 1]


def init_gan_params(key, in_channels=1, features=32):
    """Deterministic parameter init for the (assumed) generator."""
    ks = jax.random.split(key, 6)

    def conv_init(kw, kb, cin, cout):
        fan_in = 9 * cin
        w = jax.random.normal(kw, (3, 3, cin, cout), jnp.float32) * jnp.sqrt(
            2.0 / fan_in
        )
        b = jax.random.normal(kb, (cout,), jnp.float32) * 0.01
        return w, b

    p = {}
    p["w1"], p["b1"] = conv_init(ks[0], ks[1], in_channels, features)
    p["w2"], p["b2"] = conv_init(ks[2], ks[3], features, features)
    p["w3"], p["b3"] = conv_init(ks[4], ks[5], features, in_channels)
    return p


# ---------------- pure-JAX reference for correctness ----------------
def _conv3x3_ref(x_nhwc, w_hwio, b, activation):
    out = lax.conv_general_dilated(
        x_nhwc, w_hwio, window_strides=(1, 1), padding="SAME",
        dimension_numbers=("NHWC", "HWIO", "NHWC"),
    ) + b
    if activation == "relu":
        out = jnp.maximum(out, 0.0)
    elif activation == "tanh":
        out = jnp.tanh(out)
    return out


def _gan_forward_ref(params, x_nchw):
    x = jnp.transpose(x_nchw, (0, 2, 3, 1))
    h = _conv3x3_ref(x, params["w1"], params["b1"], "relu")
    h = _conv3x3_ref(h, params["w2"], params["b2"], "relu")
    h = _conv3x3_ref(h, params["w3"], params["b3"], "tanh")
    return jnp.transpose(h, (0, 3, 1, 2))


if __name__ == "__main__":
    key = jax.random.PRNGKey(0)
    k_param, k_x = jax.random.split(key)

    in_channels, features = 1, 32
    params = init_gan_params(k_param, in_channels=in_channels, features=features)
    x = jax.random.normal(k_x, (2, in_channels, 16, 16), jnp.float32)

    out = gan_forward(params, x)
    out = jax.block_until_ready(out)

    ref = _gan_forward_ref(params, x)
    assert out.shape == ref.shape == (2, in_channels, 16, 16)
    assert jnp.allclose(out, ref, rtol=1e-3, atol=1e-3), "mismatch vs JAX conv reference"

    print("KERNEL_OK")
</pallas_src>

<mosaic_0001>
module attributes {stable_mosaic.version = 11 : i64} {
  func.func @kernel(%arg0: i32, %arg1: memref<1x1x362xf32, #tpu.memory_space<vmem>>, %arg2: memref<32x9xf32, #tpu.memory_space<vmem>>, %arg3: memref<32x1xf32, #tpu.memory_space<vmem>>, %arg4: memref<32x288xf32, #tpu.memory_space<vmem>>, %arg5: memref<32x1xf32, #tpu.memory_space<vmem>>, %arg6: memref<1x288xf32, #tpu.memory_space<vmem>>, %arg7: memref<1x1xf32, #tpu.memory_space<vmem>>, %arg8: memref<1x324xf32, #tpu.memory_space<vmem>>, %arg9: memref<1x1x324xf32, #tpu.memory_space<vmem>>, %arg10: memref<32x362xf32, #tpu.memory_space<vmem>>, %arg11: memref<32x362xf32, #tpu.memory_space<vmem>>, %arg12: memref<288x324xf32, #tpu.memory_space<vmem>>) attributes {dimension_semantics = [#tpu.dimension_semantics<parallel>], iteration_bounds = array<i64: 2>, scalar_prefetch = 0 : i64, scratch_operands = 3 : i64, tpu.core_type = #tpu.core_type<tc>, window_params = [{transform_indices = @transform_0, window_bounds = array<i64: 1, 1, 362>}, {pipeline_mode = #tpu.pipeline_mode<synchronous>, transform_indices = @transform_1, window_bounds = array<i64: 32, 9>}, {pipeline_mode = #tpu.pipeline_mode<synchronous>, transform_indices = @transform_2, window_bounds = array<i64: 32, 1>}, {pipeline_mode = #tpu.pipeline_mode<synchronous>, transform_indices = @transform_3, window_bounds = array<i64: 32, 288>}, {pipeline_mode = #tpu.pipeline_mode<synchronous>, transform_indices = @transform_4, window_bounds = array<i64: 32, 1>}, {pipeline_mode = #tpu.pipeline_mode<synchronous>, transform_indices = @transform_5, window_bounds = array<i64: 1, 288>}, {pipeline_mode = #tpu.pipeline_mode<synchronous>, transform_indices = @transform_6, window_bounds = array<i64: 1, 1>}, {pipeline_mode = #tpu.pipeline_mode<synchronous>, transform_indices = @transform_7, window_bounds = array<i64: 1, 324>}, {transform_indices = @transform_8, window_bounds = array<i64: 1, 1, 324>}]} {
    %c0 = arith.constant 0 : index
    %c0_0 = arith.constant 0 : index
    %0 = vector.load %arg8[%c0, %c0_0] : memref<1x324xf32, #tpu.memory_space<vmem>>, vector<1x324xf32>
    %cst = arith.constant 0.000000e+00 : f32
    %1 = vector.broadcast %cst : f32 to vector<32x19xf32>
    %c0_1 = arith.constant 0 : index
    %c0_2 = arith.constant 0 : index
    %c0_3 = arith.constant 0 : index
    %2 = vector.load %arg1[%c0_1, %c0_2, %c0_3] : memref<1x1x362xf32, #tpu.memory_space<vmem>>, vector<1x1x324xf32>
    %3 = vector.shape_cast %2 : vector<1x1x324xf32> to vector<1x324xf32>
    %c0_4 = arith.constant 0 : index
    %c0_5 = arith.constant 0 : index
    %4 = vector.load %arg12[%c0_4, %c0_5] : memref<288x324xf32, #tpu.memory_space<vmem>>, vector<1x324xf32>
    tpu.vector_store %arg12[%c0_4, %c0_5], %3 {strides = array<i32>} : memref<288x324xf32, #tpu.memory_space<vmem>>, vector<1x324xf32>,
    %c0_6 = arith.constant 0 : index
    %c0_7 = arith.constant 0 : index
    %c1 = arith.constant 1 : index
    %5 = vector.load %arg1[%c0_6, %c0_7, %c1] : memref<1x1x362xf32, #tpu.memory_space<vmem>>, vector<1x1x324xf32>
    %6 = vector.shape_cast %5 : vector<1x1x324xf32> to vector<1x324xf32>
    %c1_8 = arith.constant 1 : index
    %c0_9 = arith.constant 0 : index
    %7 = vector.load %arg12[%c1_8, %c0_9] : memref<288x324xf32, #tpu.memory_space<vmem>>, vector<1x324xf32>
    tpu.vector_store %arg12[%c1_8, %c0_9], %6 {strides = array<i32>} : memref<288x324xf32, #tpu.memory_space<vmem>>, vector<1x324xf32>,
    %c0_10 = arith.constant 0 : index
    %c0_11 = arith.constant 0 : index
    %c2 = arith.constant 2 : index
    %8 = vector.load %arg1[%c0_10, %c0_11, %c2] : memref<1x1x362xf32, #tpu.memory_space<vmem>>, vector<1x1x324xf32>
    %9 = vector.shape_cast %8 : vector<1x1x324xf32> to vector<1x324xf32>
    %c2_12 = arith.constant 2 : index
    %c0_13 = arith.constant 0 : index
    %10 = vector.load %arg12[%c2_12, %c0_13] : memref<288x324xf32, #tpu.memory_space<vmem>>, vector<1x324xf32>
    tpu.vector_store %arg12[%c2_12, %c0_13], %9 {strides = array<i32>} : memref<288x324xf32, #tpu.memory_space<vmem>>, vector<1x324xf32>,
    %c0_14 = arith.constant 0 : index
    %c0_15 = arith.constant 0 : index
    %c18 = arith.constant 18 : index
    %11 = vector.load %arg1[%c0_14, %c0_15, %c18] : memref<1x1x362xf32, #tpu.memory_space<vmem>>, vector<1x1x324xf32>
    %12 = vector.shape_cast %11 : vector<1x1x324xf32> to vector<1x324xf32>
    %c3 = arith.constant 3 : index
    %c0_16 = arith.constant 0 : index
    %13 = vector.load %arg12[%c3, %c0_16] : memref<288x324xf32, #tpu.memory_space<vmem>>, vector<1x324xf32>
    tpu.vector_store %arg12[%c3, %c0_16], %12 {strides = array<i32>} : memref<288x324xf32, #tpu.memory_space<vmem>>, vector<1x324xf32>,
    %c0_17 = arith.constant 0 : index
    %c0_18 = arith.constant 0 : index
    %c19 = arith.constant 19 : index
    %14 = vector.load %arg1[%c0_17, %c0_18, %c19] : memref<1x1x362xf32, #tpu.memory_space<vmem>>, vector<1x1x324xf32>
    %15 = vector.shape_cast %14 : vector<1x1x324xf32> to vector<1x324xf32>
    %c4 = arith.constant 4 : index
    %c0_19 = arith.constant 0 : index
    %16 = vector.load %arg12[%c4, %c0_19] : memref<288x324xf32, #tpu.memory_space<vmem>>, vector<1x324xf32>
    tpu.vector_store %arg12[%c4, %c0_19], %15 {strides = array<i32>} : memref<288x324xf32, #tpu.memory_space<vmem>>, vector<1x324xf32>,
    %c0_20 = arith.constant 0 : index
    %c0_21 = arith.constant 0 : index
    %c20 = arith.constant 20 : index
    %17 = vector.load %arg1[%c0_20, %c0_21, %c20] : memref<1x1x362xf32, #tpu.memory_space<vmem>>, vector<1x1x324xf32>
    %18 = vector.shape_cast %17 : vector<1x1x324xf32> to vector<1x324xf32>
    %c5 = arith.constant 5 : index
    %c0_22 = arith.constant 0 : index
    %19 = vector.load %arg12[%c5, %c0_22] : memref<288x324xf32, #tpu.memory_space<vmem>>, vector<1x324xf32>
    tpu.vector_store %arg12[%c5, %c0_22], %18 {strides = array<i32>} : memref<288x324xf32, #tpu.memory_space<vmem>>, vector<1x324xf32>,
    %c0_23 = arith.constant 0 : index
    %c0_24 = arith.constant 0 : index
    %c36 = arith.constant 36 : index
    %20 = vector.load %arg1[%c0_23, %c0_24, %c36] : memref<1x1x362xf32, #tpu.memory_space<vmem>>, vector<1x1x324xf32>
    %21 = vector.shape_cast %20 : vector<1x1x324xf32> to vector<1x324xf32>
    %c6 = arith.constant 6 : index
    %c0_25 = arith.constant 0 : index
    %22 = vector.load %arg12[%c6, %c0_25] : memref<288x324xf32, #tpu.memory_space<vmem>>, vector<1x324xf32>
    tpu.vector_store %arg12[%c6, %c0_25], %21 {strides = array<i32>} : memref<288x324xf32, #tpu.memory_space<vmem>>, vector<1x324xf32>,
    %c0_26 = arith.constant 0 : index
    %c0_27 = arith.constant 0 : index
    %c37 = arith.constant 37 : index
    %23 = vector.load %arg1[%c0_26, %c0_27, %c37] : memref<1x1x362xf32, #tpu.memory_space<vmem>>, vector<1x1x324xf32>
    %24 = vector.shape_cast %23 : vector<1x1x324xf32> to vector<1x324xf32>
    %c7 = arith.constant 7 : index
    %c0_28 = arith.constant 0 : index
    %25 = vector.load %arg12[%c7, %c0_28] : memref<288x324xf32, #tpu.memory_space<vmem>>, vector<1x324xf32>
    tpu.vector_store %arg12[%c7, %c0_28], %24 {strides = array<i32>} : memref<288x324xf32, #tpu.memory_space<vmem>>, vector<1x324xf32>,
    %c0_29 = arith.constant 0 : index
    %c0_30 = arith.constant 0 : index
    %c38 = arith.constant 38 : index
    %26 = vector.load %arg1[%c0_29, %c0_30, %c38] : memref<1x1x362xf32, #tpu.memory_space<vmem>>, vector<1x1x324xf32>
    %27 = vector.shape_cast %26 : vector<1x1x324xf32> to vector<1x324xf32>
    %c8 = arith.constant 8 : index
    %c0_31 = arith.constant 0 : index
    %28 = vector.load %arg12[%c8, %c0_31] : memref<288x324xf32, #tpu.memory_space<vmem>>, vector<1x324xf32>
    tpu.vector_store %arg12[%c8, %c0_31], %27 {strides = array<i32>} : memref<288x324xf32, #tpu.memory_space<vmem>>, vector<1x324xf32>,
    %c0_32 = arith.constant 0 : index
    %c0_33 = arith.constant 0 : index
    %29 = vector.load %arg2[%c0_32, %c0_33] : memref<32x9xf32, #tpu.memory_space<vmem>>, vector<32x9xf32>
    %c0_34 = arith.constant 0 : index
    %c0_35 = arith.constant 0 : index
    %30 = vector.load %arg12[%c0_34, %c0_35] : memref<288x324xf32, #tpu.memory_space<vmem>>, vector<9x324xf32>
    %cst_36 = arith.constant dense<0.000000e+00> : vector<32x324xf32>
    %31 = tpu.matmul %29, %30, %cst_36 {dimension_numbers = #tpu.dot_dimension_numbers<[1], [0], [0], [1], [0, 0, 1, 1], [], []>} : vector<32x9xf32>, vector<9x324xf32>, vector<32x324xf32> -> vector<32x324xf32>
    %c0_37 = arith.constant 0 : index
    %c0_38 = arith.constant 0 : index
    %32 = vector.load %arg3[%c0_37, %c0_38] : memref<32x1xf32, #tpu.memory_space<vmem>>, vector<32x1xf32>
    %33 = vector.broadcast %32 : vector<32x1xf32> to vector<32x324xf32>
    %34 = arith.addf %31, %33 : vector<32x324xf32>
    %c0_39 = arith.constant 0 : index
    %c0_40 = arith.constant 0 : index
    %35 = vector.load %arg10[%c0_39, %c0_40] : memref<32x362xf32, #tpu.memory_space<vmem>>, vector<32x19xf32>
    tpu.vector_store %arg10[%c0_39, %c0_40], %1 {strides = array<i32>} : memref<32x362xf32, #tpu.memory_space<vmem>>, vector<32x19xf32>,
    %c0_41 = arith.constant 0 : index
    %c343 = arith.constant 343 : index
    %36 = vector.load %arg10[%c0_41, %c343] : memref<32x362xf32, #tpu.memory_space<vmem>>, vector<32x19xf32>
    tpu.vector_store %arg10[%c0_41, %c343], %1 {strides = array<i32>} : memref<32x362xf32, #tpu.memory_space<vmem>>, vector<32x19xf32>,
    %cst_42 = arith.constant 0.000000e+00 : f32
    %37 = vector.broadcast %cst_42 : f32 to vector<32x324xf32>
    %38 = arith.maximumf %34, %37 : vector<32x324xf32>
    %39 = vector.broadcast %0 : vector<1x324xf32> to vector<32x324xf32>
    %40 = arith.mulf %38, %39 : vector<32x324xf32>
    %c0_43 = arith.constant 0 : index
    %c19_44 = arith.constant 19 : index
    %41 = vector.load %arg10[%c0_43, %c19_44] : memref<32x362xf32, #tpu.memory_space<vmem>>, vector<32x324xf32>
    tpu.vector_store %arg10[%c0_43, %c19_44], %40 {strides = array<i32>} : memref<32x362xf32, #tpu.memory_space<vmem>>, vector<32x324xf32>,
    %c0_45 = arith.constant 0 : index
    %c0_46 = arith.constant 0 : index
    %42 = vector.load %arg10[%c0_45, %c0_46] : memref<32x362xf32, #tpu.memory_space<vmem>>, vector<32x324xf32>
    %c0_47 = arith.constant 0 : index
    %c0_48 = arith.constant 0 : index
    %43 = vector.load %arg12[%c0_47, %c0_48] : memref<288x324xf32, #tpu.memory_space<vmem>>, vector<32x324xf32>
    tpu.vector_store %arg12[%c0_47, %c0_48], %42 {strides = array<i32>} : memref<288x324xf32, #tpu.memory_space<vmem>>, vector<32x324xf32>,
    %c0_49 = arith.constant 0 : index
    %c1_50 = arith.constant 1 : index
    %44 = vector.load %arg10[%c0_49, %c1_50] : memref<32x362xf32, #tpu.memory_space<vmem>>, vector<32x324xf32>
    %c32 = arith.constant 32 : index
    %c0_51 = arith.constant 0 : index
    %45 = vector.load %arg12[%c32, %c0_51] : memref<288x324xf32, #tpu.memory_space<vmem>>, vector<32x324xf32>
    tpu.vector_store %arg12[%c32, %c0_51], %44 {strides = array<i32>} : memref<288x324xf32, #tpu.memory_space<vmem>>, vector<32x324xf32>,
    %c0_52 = arith.constant 0 : index
    %c2_53 = arith.constant 2 : index
    %46 = vector.load %arg10[%c0_52, %c2_53] : memref<32x362xf32, #tpu.memory_space<vmem>>, vector<32x324xf32>
    %c64 = arith.constant 64 : index
    %c0_54 = arith.constant 0 : index
    %47 = vector.load %arg12[%c64, %c0_54] : memref<288x324xf32, #tpu.memory_space<vmem>>, vector<32x324xf32>
    tpu.vector_store %arg12[%c64, %c0_54], %46 {strides = array<i32>} : memref<288x324xf32, #tpu.memory_space<vmem>>, vector<32x324xf32>,
    %c0_55 = arith.constant 0 : index
    %c18_56 = arith.constant 18 : index
    %48 = vector.load %arg10[%c0_55, %c18_56] : memref<32x362xf32, #tpu.memory_space<vmem>>, vector<32x324xf32>
    %c96 = arith.constant 96 : index
    %c0_57 = arith.constant 0 : index
    %49 = vector.load %arg12[%c96, %c0_57] : memref<288x324xf32, #tpu.memory_space<vmem>>, vector<32x324xf32>
    tpu.vector_store %arg12[%c96, %c0_57], %48 {strides = array<i32>} : memref<288x324xf32, #tpu.memory_space<vmem>>, vector<32x324xf32>,
    %c0_58 = arith.constant 0 : index
    %c19_59 = arith.constant 19 : index
    %50 = vector.load %arg10[%c0_58, %c19_59] : memref<32x362xf32, #tpu.memory_space<vmem>>, vector<32x324xf32>
    %c128 = arith.constant 128 : index
    %c0_60 = arith.constant 0 : index
    %51 = vector.load %arg12[%c128, %c0_60] : memref<288x324xf32, #tpu.memory_space<vmem>>, vector<32x324xf32>
    tpu.vector_store %arg12[%c128, %c0_60], %50 {strides = array<i32>} : memref<288x324xf32, #tpu.memory_space<vmem>>, vector<32x324xf32>,
    %c0_61 = arith.constant 0 : index
    %c20_62 = arith.constant 20 : index
    %52 = vector.load %arg10[%c0_61, %c20_62] : memref<32x362xf32, #tpu.memory_space<vmem>>, vector<32x324xf32>
    %c160 = arith.constant 160 : index
    %c0_63 = arith.constant 0 : index
    %53 = vector.load %arg12[%c160, %c0_63] : memref<288x324xf32, #tpu.memory_space<vmem>>, vector<32x324xf32>
    tpu.vector_store %arg12[%c160, %c0_63], %52 {strides = array<i32>} : memref<288x324xf32, #tpu.memory_space<vmem>>, vector<32x324xf32>,
    %c0_64 = arith.constant 0 : index
    %c36_65 = arith.constant 36 : index
    %54 = vector.load %arg10[%c0_64, %c36_65] : memref<32x362xf32, #tpu.memory_space<vmem>>, vector<32x324xf32>
    %c192 = arith.constant 192 : index
    %c0_66 = arith.constant 0 : index
    %55 = vector.load %arg12[%c192, %c0_66] : memref<288x324xf32, #tpu.memory_space<vmem>>, vector<32x324xf32>
    tpu.vector_store %arg12[%c192, %c0_66], %54 {strides = array<i32>} : memref<288x324xf32, #tpu.memory_space<vmem>>, vector<32x324xf32>,
    %c0_67 = arith.constant 0 : index
    %c37_68 = arith.constant 37 : index
    %56 = vector.load %arg10[%c0_67, %c37_68] : memref<32x362xf32, #tpu.memory_space<vmem>>, vector<32x324xf32>
    %c224 = arith.constant 224 : index
    %c0_69 = arith.constant 0 : index
    %57 = vector.load %arg12[%c224, %c0_69] : memref<288x324xf32, #tpu.memory_space<vmem>>, vector<32x324xf32>
    tpu.vector_store %arg12[%c224, %c0_69], %56 {strides = array<i32>} : memref<288x324xf32, #tpu.memory_space<vmem>>, vector<32x324xf32>,
    %c0_70 = arith.constant 0 : index
    %c38_71 = arith.constant 38 : index
    %58 = vector.load %arg10[%c0_70, %c38_71] : memref<32x362xf32, #tpu.memory_space<vmem>>, vector<32x324xf32>
    %c256 = arith.constant 256 : index
    %c0_72 = arith.constant 0 : index
    %59 = vector.load %arg12[%c256, %c0_72] : memref<288x324xf32, #tpu.memory_space<vmem>>, vector<32x324xf32>
    tpu.vector_store %arg12[%c256, %c0_72], %58 {strides = array<i32>} : memref<288x324xf32, #tpu.memory_space<vmem>>, vector<32x324xf32>,
    %c0_73 = arith.constant 0 : index
    %c0_74 = arith.constant 0 : index
    %60 = vector.load %arg4[%c0_73, %c0_74] : memref<32x288xf32, #tpu.memory_space<vmem>>, vector<32x288xf32>
    %c0_75 = arith.constant 0 : index
    %c0_76 = arith.constant 0 : index
    %61 = vector.load %arg12[%c0_75, %c0_76] : memref<288x324xf32, #tpu.memory_space<vmem>>, vector<288x324xf32>
    %cst_77 = arith.constant dense<0.000000e+00> : vector<32x324xf32>
    %62 = tpu.matmul %60, %61, %cst_77 {dimension_numbers = #tpu.dot_dimension_numbers<[1], [0], [0], [1], [0, 0, 1, 1], [], []>} : vector<32x288xf32>, vector<288x324xf32>, vector<32x324xf32> -> vector<32x324xf32>
    %c0_78 = arith.constant 0 : index
    %c0_79 = arith.constant 0 : index
    %63 = vector.load %arg5[%c0_78, %c0_79] : memref<32x1xf32, #tpu.memory_space<vmem>>, vector<32x1xf32>
    %64 = vector.broadcast %63 : vector<32x1xf32> to vector<32x324xf32>
    %65 = arith.addf %62, %64 : vector<32x324xf32>
    %c0_80 = arith.constant 0 : index
    %c0_81 = arith.constant 0 : index
    %66 = vector.load %arg11[%c0_80, %c0_81] : memref<32x362xf32, #tpu.memory_space<vmem>>, vector<32x19xf32>
    tpu.vector_store %arg11[%c0_80, %c0_81], %1 {strides = array<i32>} : memref<32x362xf32, #tpu.memory_space<vmem>>, vector<32x19xf32>,
    %c0_82 = arith.constant 0 : index
    %c343_83 = arith.constant 343 : index
    %67 = vector.load %arg11[%c0_82, %c343_83] : memref<32x362xf32, #tpu.memory_space<vmem>>, vector<32x19xf32>
    tpu.vector_store %arg11[%c0_82, %c343_83], %1 {strides = array<i32>} : memref<32x362xf32, #tpu.memory_space<vmem>>, vector<32x19xf32>,
    %cst_84 = arith.constant 0.000000e+00 : f32
    %68 = vector.broadcast %cst_84 : f32 to vector<32x324xf32>
    %69 = arith.maximumf %65, %68 : vector<32x324xf32>
    %70 = vector.broadcast %0 : vector<1x324xf32> to vector<32x324xf32>
    %71 = arith.mulf %69, %70 : vector<32x324xf32>
    %c0_85 = arith.constant 0 : index
    %c19_86 = arith.constant 19 : index
    %72 = vector.load %arg11[%c0_85, %c19_86] : memref<32x362xf32, #tpu.memory_space<vmem>>, vector<32x324xf32>
    tpu.vector_store %arg11[%c0_85, %c19_86], %71 {strides = array<i32>} : memref<32x362xf32, #tpu.memory_space<vmem>>, vector<32x324xf32>,
    %c0_87 = arith.constant 0 : index
    %c0_88 = arith.constant 0 : index
    %73 = vector.load %arg11[%c0_87, %c0_88] : memref<32x362xf32, #tpu.memory_space<vmem>>, vector<32x324xf32>
    %c0_89 = arith.constant 0 : index
    %c0_90 = arith.constant 0 : index
    %74 = vector.load %arg12[%c0_89, %c0_90] : memref<288x324xf32, #tpu.memory_space<vmem>>, vector<32x324xf32>
    tpu.vector_store %arg12[%c0_89, %c0_90], %73 {strides = array<i32>} : memref<288x324xf32, #tpu.memory_space<vmem>>, vector<32x324xf32>,
    %c0_91 = arith.constant 0 : index
    %c1_92 = arith.constant 1 : index
    %75 = vector.load %arg11[%c0_91, %c1_92] : memref<32x362xf32, #tpu.memory_space<vmem>>, vector<32x324xf32>
    %c32_93 = arith.constant 32 : index
    %c0_94 = arith.constant 0 : index
    %76 = vector.load %arg12[%c32_93, %c0_94] : memref<288x324xf32, #tpu.memory_space<vmem>>, vector<32x324xf32>
    tpu.vector_store %arg12[%c32_93, %c0_94], %75 {strides = array<i32>} : memref<288x324xf32, #tpu.memory_space<vmem>>, vector<32x324xf32>,
    %c0_95 = arith.constant 0 : index
    %c2_96 = arith.constant 2 : index
    %77 = vector.load %arg11[%c0_95, %c2_96] : memref<32x362xf32, #tpu.memory_space<vmem>>, vector<32x324xf32>
    %c64_97 = arith.constant 64 : index
    %c0_98 = arith.constant 0 : index
    %78 = vector.load %arg12[%c64_97, %c0_98] : memref<288x324xf32, #tpu.memory_space<vmem>>, vector<32x324xf32>
    tpu.vector_store %arg12[%c64_97, %c0_98], %77 {strides = array<i32>} : memref<288x324xf32, #tpu.memory_space<vmem>>, vector<32x324xf32>,
    %c0_99 = arith.constant 0 : index
    %c18_100 = arith.constant 18 : index
    %79 = vector.load %arg11[%c0_99, %c18_100] : memref<32x362xf32, #tpu.memory_space<vmem>>, vector<32x324xf32>
    %c96_101 = arith.constant 96 : index
    %c0_102 = arith.constant 0 : index
    %80 = vector.load %arg12[%c96_101, %c0_102] : memref<288x324xf32, #tpu.memory_space<vmem>>, vector<32x324xf32>
    tpu.vector_store %arg12[%c96_101, %c0_102], %79 {strides = array<i32>} : memref<288x324xf32, #tpu.memory_space<vmem>>, vector<32x324xf32>,
    %c0_103 = arith.constant 0 : index
    %c19_104 = arith.constant 19 : index
    %81 = vector.load %arg11[%c0_103, %c19_104] : memref<32x362xf32, #tpu.memory_space<vmem>>, vector<32x324xf32>
    %c128_105 = arith.constant 128 : index
    %c0_106 = arith.constant 0 : index
    %82 = vector.load %arg12[%c128_105, %c0_106] : memref<288x324xf32, #tpu.memory_space<vmem>>, vector<32x324xf32>
    tpu.vector_store %arg12[%c128_105, %c0_106], %81 {strides = array<i32>} : memref<288x324xf32, #tpu.memory_space<vmem>>, vector<32x324xf32>,
    %c0_107 = arith.constant 0 : index
    %c20_108 = arith.constant 20 : index
    %83 = vector.load %arg11[%c0_107, %c20_108] : memref<32x362xf32, #tpu.memory_space<vmem>>, vector<32x324xf32>
    %c160_109 = arith.constant 160 : index
    %c0_110 = arith.constant 0 : index
    %84 = vector.load %arg12[%c160_109, %c0_110] : memref<288x324xf32, #tpu.memory_space<vmem>>, vector<32x324xf32>
    tpu.vector_store %arg12[%c160_109, %c0_110], %83 {strides = array<i32>} : memref<288x324xf32, #tpu.memory_space<vmem>>, vector<32x324xf32>,
    %c0_111 = arith.constant 0 : index
    %c36_112 = arith.constant 36 : index
    %85 = vector.load %arg11[%c0_111, %c36_112] : memref<32x362xf32, #tpu.memory_space<vmem>>, vector<32x324xf32>
    %c192_113 = arith.constant 192 : index
    %c0_114 = arith.constant 0 : index
    %86 = vector.load %arg12[%c192_113, %c0_114] : memref<288x324xf32, #tpu.memory_space<vmem>>, vector<32x324xf32>
    tpu.vector_store %arg12[%c192_113, %c0_114], %85 {strides = array<i32>} : memref<288x324xf32, #tpu.memory_space<vmem>>, vector<32x324xf32>,
    %c0_115 = arith.constant 0 : index
    %c37_116 = arith.constant 37 : index
    %87 = vector.load %arg11[%c0_115, %c37_116] : memref<32x362xf32, #tpu.memory_space<vmem>>, vector<32x324xf32>
    %c224_117 = arith.constant 224 : index
    %c0_118 = arith.constant 0 : index
    %88 = vector.load %arg12[%c224_117, %c0_118] : memref<288x324xf32, #tpu.memory_space<vmem>>, vector<32x324xf32>
    tpu.vector_store %arg12[%c224_117, %c0_118], %87 {strides = array<i32>} : memref<288x324xf32, #tpu.memory_space<vmem>>, vector<32x324xf32>,
    %c0_119 = arith.constant 0 : index
    %c38_120 = arith.constant 38 : index
    %89 = vector.load %arg11[%c0_119, %c38_120] : memref<32x362xf32, #tpu.memory_space<vmem>>, vector<32x324xf32>
    %c256_121 = arith.constant 256 : index
    %c0_122 = arith.constant 0 : index
    %90 = vector.load %arg12[%c256_121, %c0_122] : memref<288x324xf32, #tpu.memory_space<vmem>>, vector<32x324xf32>
    tpu.vector_store %arg12[%c256_121, %c0_122], %89 {strides = array<i32>} : memref<288x324xf32, #tpu.memory_space<vmem>>, vector<32x324xf32>,
    %c0_123 = arith.constant 0 : index
    %c0_124 = arith.constant 0 : index
    %91 = vector.load %arg6[%c0_123, %c0_124] : memref<1x288xf32, #tpu.memory_space<vmem>>, vector<1x288xf32>
    %c0_125 = arith.constant 0 : index
    %c0_126 = arith.constant 0 : index
    %92 = vector.load %arg12[%c0_125, %c0_126] : memref<288x324xf32, #tpu.memory_space<vmem>>, vector<288x324xf32>
    %cst_127 = arith.constant dense<0.000000e+00> : vector<1x324xf32>
    %93 = tpu.matmul %91, %92, %cst_127 {dimension_numbers = #tpu.dot_dimension_numbers<[1], [0], [0], [1], [0, 0, 1, 1], [], []>} : vector<1x288xf32>, vector<288x324xf32>, vector<1x324xf32> -> vector<1x324xf32>
    %c0_128 = arith.constant 0 : index
    %c0_129 = arith.constant 0 : index
    %94 = vector.load %arg7[%c0_128, %c0_129] : memref<1x1xf32, #tpu.memory_space<vmem>>, vector<1x1xf32>
    %95 = vector.broadcast %94 : vector<1x1xf32> to vector<1x324xf32>
    %96 = arith.addf %93, %95 : vector<1x324xf32>
    %97 = math.tanh %96 : vector<1x324xf32>
    %c0_130 = arith.constant 0 : index
    %c0_131 = arith.constant 0 : index
    %c0_132 = arith.constant 0 : index
    %98 = vector.load %arg9[%c0_130, %c0_131, %c0_132] : memref<1x1x324xf32, #tpu.memory_space<vmem>>, vector<1x1x324xf32>
    %99 = vector.shape_cast %98 : vector<1x1x324xf32> to vector<1x324xf32>
    %100 = vector.shape_cast %97 : vector<1x324xf32> to vector<1x1x324xf32>
    tpu.vector_store %arg9[%c0_130, %c0_131, %c0_132], %100 {strides = array<i32>} : memref<1x1x324xf32, #tpu.memory_space<vmem>>, vector<1x1x324xf32>,
    return
  }
  func.func @transform_0(%arg0: i32) -> (i32, i32, i32) {
    %c0_i32 = arith.constant 0 : i32
    %c0_i32_0 = arith.constant 0 : i32
    %c0_i32_1 = arith.constant 0 : i32
    return %arg0, %c0_i32, %c0_i32_0 : i32, i32, i32
  }
  func.func @transform_1(%arg0: i32) -> (i32, i32) {
    %c0_i32 = arith.constant 0 : i32
    %c0_i32_0 = arith.constant 0 : i32
    %c0_i32_1 = arith.constant 0 : i32
    return %c0_i32, %c0_i32_0 : i32, i32
  }
  func.func @transform_2(%arg0: i32) -> (i32, i32) {
    %c0_i32 = arith.constant 0 : i32
    %c0_i32_0 = arith.constant 0 : i32
    %c0_i32_1 = arith.constant 0 : i32
    return %c0_i32, %c0_i32_0 : i32, i32
  }
  func.func @transform_3(%arg0: i32) -> (i32, i32) {
    %c0_i32 = arith.constant 0 : i32
    %c0_i32_0 = arith.constant 0 : i32
    %c0_i32_1 = arith.constant 0 : i32
    return %c0_i32, %c0_i32_0 : i32, i32
  }
  func.func @transform_4(%arg0: i32) -> (i32, i32) {
    %c0_i32 = arith.constant 0 : i32
    %c0_i32_0 = arith.constant 0 : i32
    %c0_i32_1 = arith.constant 0 : i32
    return %c0_i32, %c0_i32_0 : i32, i32
  }
  func.func @transform_5(%arg0: i32) -> (i32, i32) {
    %c0_i32 = arith.constant 0 : i32
    %c0_i32_0 = arith.constant 0 : i32
    %c0_i32_1 = arith.constant 0 : i32
    return %c0_i32, %c0_i32_0 : i32, i32
  }
  func.func @transform_6(%arg0: i32) -> (i32, i32) {
    %c0_i32 = arith.constant 0 : i32
    %c0_i32_0 = arith.constant 0 : i32
    %c0_i32_1 = arith.constant 0 : i32
    return %c0_i32, %c0_i32_0 : i32, i32
  }
  func.func @transform_7(%arg0: i32) -> (i32, i32) {
    %c0_i32 = arith.constant 0 : i32
    %c0_i32_0 = arith.constant 0 : i32
    %c0_i32_1 = arith.constant 0 : i32
    return %c0_i32, %c0_i32_0 : i32, i32
  }
  func.func @transform_8(%arg0: i32) -> (i32, i32, i32) {
    %c0_i32 = arith.constant 0 : i32
    %c0_i32_0 = arith.constant 0 : i32
    %c0_i32_1 = arith.constant 0 : i32
    return %arg0, %c0_i32, %c0_i32_0 : i32, i32, i32
  }
}

</mosaic_0001>

<bundles_post_ra>
// kernel: gan_forward.1
= control target key start
LH: loop header
LB: loop body
LE: loop exit
PB: predicated region body
PF: predicated region fallthrough
CT: control target
= control target key end

     0   :  { %s3004_s29 = smov 0   ;;  %s4592_s0 = inlined_call_operand.vmem [shape: f32[2,1,362], index: 0, kind: input, shape index: {}]   ;;  %s4593_s1 = inlined_call_operand.vmem [shape: f32[32,9], index: 1, kind: input, shape index: {}]   ;;  %s4594_s2 = inlined_call_operand.vmem [shape: f32[32,1], index: 2, kind: input, shape index: {}]   ;;  %s4595_s3 = inlined_call_operand.vmem [shape: f32[32,288], index: 3, kind: input, shape index: {}]   ;;  %s4596_s4 = inlined_call_operand.vmem [shape: f32[32,1], index: 4, kind: input, shape index: {}]   ;;  %s4597_s5 = inlined_call_operand.vmem [shape: f32[1,288], index: 5, kind: input, shape index: {}]   ;;  %s4598_s6 = inlined_call_operand.<no memory space> [shape: f32[1,1], index: 6, kind: input, shape index: {}]   ;;  %s4599_s7 = inlined_call_operand.vmem [shape: f32[1,324], index: 7, kind: input, shape index: {}]   ;;  %s4600_s8 = inlined_call_operand.vmem [shape: f32[2,1,324], index: 8, kind: output, shape index: {}]  }
   0x1   :  { %v13_v0 = vstv %s4598_s6 }
   0x2   :  { %14 = vst [vmem:[#allocation5] sm:$0x1] %v13_v0 }
   0x3 LB: > { %s2871_s30 = sadd.s32 4294967295, %s2943_s29   ;;  %p2875_p0 = scmp.ge.s32.totalorder %s2943_s29, 1  ;;  %s2943_s29 = sphi %s3004_s29, %s20_s29  }
   0x4   : > { %p263_p1 = scmp.lt.s32.totalorder %s2943_s29, 3 }
   0x6   : > { %p264_p2 = pnand %p2875_p0, %p263_p1 }
   0x8   : > { %267 = sbr.rel (%p264_p2) target bundleno = 1538 (0x602), region = 52 }
   0xd   : > { %p295_p3 = scmp.lt.s32.totalorder %s2871_s30, 1  ;;  %s2945_s12 = smov 90   ;;  %v305_v9 = vlaneseq  ;;  %vm349_vm0 = vcmask 891904   ;;  %v4620_v12 = vmov 0  ;;  %vm360_vm2 = vcmask 883712   ;;  %v410_v33 = vld [vmem:[%s4594_s2 + $0x8] sm:$0xff] }
   0xe   : > { %s2946_s13 = smov 126   ;;  %s2947_s14 = smov 109   ;;  %vm393_vm3 = vcmask 736256   ;;  %vm327_vm4 = vcmask 1031168   ;;  %vm338_vm5 = vcmask 900096   ;;  %vm316_vm6 = vcmask 1039360  }
   0xf   : > { %s4655_s30 = smov (!%p295_p3, %s2871_s30), 1  ;;  %s2948_s15 = smov 110   ;;  %vm3038_vm1 = vcmp.lt.s32.totalorder %v305_v9, 324  ;;  %vm446_vm7 = vcmask 1040384   ;;  %vm382_vm8 = vcmask 744448   ;;  %vm371_vm9 = vcmask 752640  }
  0x10   : > { %s2908_s6 = smul.u32 3, %s4655_s30  ;;  %s2949_s16 = smov 127   ;;  %v4621_v12 = vsel %vm3038_vm1, 4294967295, %v4620_v12  ;;  %v2953_v36 = vmov 0   ;;  %v409_v41 = vld [vmem:[%s4594_s2] sm:$0xff]  ;;  %v411_v42 = vld [vmem:[%s4594_s2 + $0x10] sm:$0xff] }
  0x11   : > { %s2950_s17 = smov 108   ;;  %s2951_s18 = smov 91   ;;  %4622 = vst [vmem:[#allocation6_spill] sm:$0xff] %v4621_v12  ;;  %2929 = vset.pattern.permute.xlu0 %v2953_v36  ;;  %2930 = vset.pattern.permute.xlu1 %v2953_v36  ;;  %v399_v43 = vld [vmem:[%s4593_s1] sm:$0xff]  ;;  %vm433_vm10 = vcmask 72704   ;;  %v412_v47 = vld [vmem:[%s4594_s2 + $0x18] sm:$0xff] }
  0x12   : > { %s3020_s11 = scalar_lea.vmem %s4592_s0, %s2908_s6  ;;  %s2952_s19 = smov 92   ;;  %2928 = vset.pattern.permute.xlu2 %v2953_v36  ;;  %v400_v48 = vld [vmem:[%s4593_s1 + $0x8] sm:$0xff]  ;;  %v401_v49 = vld [vmem:[%s4593_s1 + $0x10] sm:$0xff]  ;;  %v402_v50 = vld [vmem:[%s4593_s1 + $0x18] sm:$0xff]  ;;  %vm543_vm11 = vcmask 154624   ;;  %vm548_vm12 = vcmask 868024  }
  0x13   : > { %v388_v1 = vld [vmem:[%s3020_s11] sm:$0x7]  ;;  %s2954_s26 = smov 19   ;;  %vm640_vm13 = vcmask 1047704   ;;  %vm643_vm14 = vcmask 711680   ;;  %vm668_vm15 = vcmask 556032  }
  0x14   : > { %v322_v2 = vld [vmem:[%s3020_s11] sm:$0x7]  ;;  %390 = vrot.lane.b32.xlu0 %v388_v1, %s2945_s12 }
  0x15   : > { %324 = vrot.lane.b32.xlu1 %v322_v2, %s2946_s13  ;;  %v344_v3 = vld [vmem:[%s3020_s11] sm:$0x7] }
  0x16   : > { %346 = vrot.lane.b32.xlu2 %v344_v3, %s2947_s14  ;;  %v333_v4 = vld [vmem:[%s3020_s11] sm:$0x7] }
  0x17   : > { %v311_v5 = vld [vmem:[%s3020_s11] sm:$0x7] }
  0x18   : > { %v355_v6 = vld [vmem:[%s3020_s11] sm:$0x7] }
  0x19   : > { %v377_v7 = vld [vmem:[%s3020_s11] sm:$0x7] }
  0x1a   : > { %v366_v8 = vld [vmem:[%s3020_s11] sm:$0x7] }
  0x1b   : > { %v304_v16 = vld [vmem:[%s3020_s11] sm:$0x7] }
  0x1c   : > { %313 = vrot.lane.b32.xlu0 %v311_v5, %s2949_s16  ;;  %309 = vst.msk [vmem:[#allocation4] ss:$8 sm:$0x7] %vm3038_vm1, %v304_v16  ;;  %v303_v51 = vld [vmem:[%s4599_s7] sm:$0x7] }
  0x1d   : > { %335 = vrot.lane.b32.xlu1 %v333_v4, %s2948_s15  ;;  %v3111_v55 = vperm.slane %v303_v51, 0  ;;  %v3113_v58 = vperm.slane %v303_v51, 1  ;;  %v3118_v2 = vperm.slane %v303_v51, 2 }
  0x1e   : > { %357 = vrot.lane.b32.xlu2 %v355_v6, %s2950_s17 }
  0x1f   : > { %4623 = vst [vmem:[#allocation7_spill] sm:$0xff] %v3111_v55 }
  0x20   : > { %4624 = vst [vmem:[#allocation8_spill] sm:$0xff] %v3113_v58 }
  0x21   : > { %4625 = vst [vmem:[#allocation9_spill] sm:$0xff] %v3118_v2 }
  0x24   : > { %368 = vrot.lane.b32.xlu0 %v366_v8, %s2952_s19 }
  0x25   : > { %379 = vrot.lane.b32.xlu1 %v377_v7, %s2951_s18 }
  0x26   : > { %415 = vperm.xlu2 %2928, %v409_v41  }
  0x2c   : > { %420 = vperm.xlu0 %2929, %v410_v33  }
  0x2d   : > { %425 = vperm.xlu1 %2930, %v411_v42  }
  0x2e   : > { %430 = vperm.xlu2 %2928, %v412_v47  }
  0x70   : > { %v347_v10 = vpop.permute.xlu2 %346 }
  0x71   : > { %v348_v11 = vrot.slane %v347_v10, 1 }
  0x73   : > { %v350_v13 = vsel %vm349_vm0, %v347_v10, %v348_v11 }
  0x74   : > { %353 = vst.msk [vmem:[#allocation4 + $0x4] ss:$8 sm:$0x7] %vm3038_vm1, %v350_v13 }
  0x78   : > { %v358_v14 = vpop.permute.xlu2 %357 }
  0x79   : > { %v359_v15 = vrot.slane %v358_v14, 1 }
  0x7b   : > { %v361_v17 = vsel %vm360_vm2, %v358_v14, %v359_v15 }
  0x7c   : > { %364 = vst.msk [vmem:[#allocation4 + $0x5] ss:$8 sm:$0x7] %vm3038_vm1, %v361_v17 }
  0x80   : > { %v416_v52 = vpop.permute.xlu2 %415 }
  0x86   : > { %v391_v18 = vpop.permute.xlu0 %390 }
  0x87   : > { %v325_v19 = vpop.permute.xlu1 %324  ;;  %v392_v20 = vrot.slane %v391_v18, 1 }
  0x88   : > { %v326_v21 = vrot.slane %v325_v19, 1 }
  0x89   : > { %v394_v22 = vsel %vm393_vm3, %v391_v18, %v392_v20 }
  0x8a   : > { %v328_v23 = vsel %vm327_vm4, %v325_v19, %v326_v21  ;;  %397 = vst.msk [vmem:[#allocation4 + $0x18] ss:$8 sm:$0x7] %vm3038_vm1, %v394_v22 }
  0x8b   : > { %331 = vst.msk [vmem:[#allocation4 + $0x2] ss:$8 sm:$0x7] %vm3038_vm1, %v328_v23 }
  0x8e   : > { %v314_v25 = vpop.permute.xlu0 %313 }
  0x8f   : > { %v336_v24 = vpop.permute.xlu1 %335  ;;  %v315_v27 = vrot.slane %v314_v25, 1 }
  0x90   : > { %v337_v26 = vrot.slane %v336_v24, 1 }
  0x91   : > { %v317_v29 = vsel %vm316_vm6, %v314_v25, %v315_v27  ;;  %v406_v30 = vld [vmem:[#allocation4 + $0x18] sm:$0x1]  ;;  %v407_v31 = vld [vmem:[#allocation4 + $0x20] sm:$0x1]  ;;  %v408_v32 = vld [vmem:[#allocation4 + $0x28] sm:$0x1] }
  0x92   : > { %v339_v28 = vsel %vm338_vm5, %v336_v24, %v337_v26  ;;  %2876 = vmatpush.msk.msra.mxu0 %vm446_vm7, %v406_v30  ;;  %2881 = vmatpush.msk.msra.mxu1 %vm446_vm7, %v407_v31  ;;  %320 = vst.msk [vmem:[#allocation4 + $0x1] ss:$8 sm:$0x7] %vm3038_vm1, %v317_v29 }
  0x93   : > { %342 = vst.msk [vmem:[#allocation4 + $0x3] ss:$8 sm:$0x7] %vm3038_vm1, %v339_v28  ;;  %2886 = vmatpush.msk.msra.mxu2 %vm446_vm7, %v408_v32  ;;  %v431_v28 = vpop.permute.xlu2 %430 }
  0x96   : > { %v369_v35 = vpop.permute.xlu0 %368 }
  0x97   : > { %v380_v34 = vpop.permute.xlu1 %379  ;;  %v370_v38 = vrot.slane %v369_v35, 1 }
  0x98   : > { %v381_v37 = vrot.slane %v380_v34, 1 }
  0x99   : > { %v372_v40 = vsel %vm371_vm9, %v369_v35, %v370_v38 }
  0x9a   : > { %v383_v39 = vsel %vm382_vm8, %v380_v34, %v381_v37  ;;  %375 = vst.msk [vmem:[#allocation4 + $0x6] ss:$8 sm:$0x7] %vm3038_vm1, %v372_v40 }
  0x9b   : > { %386 = vst.msk [vmem:[#allocation4 + $0x7] ss:$8 sm:$0x7] %vm3038_vm1, %v383_v39 }
  0x9e   : > { %v421_v63 = vpop.permute.xlu0 %420 }
  0x9f   : > { %v426_v14 = vpop.permute.xlu1 %425 }
  0xa2   : > { %v403_v44 = vld [vmem:[#allocation4] sm:$0xff]  ;;  %v404_v45 = vld [vmem:[#allocation4 + $0x8] sm:$0xff]  ;;  %v405_v46 = vld [vmem:[#allocation4 + $0x10] sm:$0xff] }
  0xa3   : > { %471 = vmatpush.msra.mxu0 %v403_v44  ;;  %500 = vmatpush.msra.mxu1 %v404_v45  ;;  %v2955_v44 = vmov 0.0  }
  0xa4   : > { %529 = vmatpush.msra.mxu2 %v405_v46  ;;  %2877 = vmatmul.msk.f32.vlgmr.msra.gmra.mxu0 %vm433_vm10, %v399_v43  ;;  %544 = vst.msk [vmem:[#allocation2] sm:$0xff] %vm543_vm11, %v2955_v44 }
  0xa5   : > { %2882 = vmatmul.msk.f32.vlgmr.msra.gmra.mxu1 %vm433_vm10, %v399_v43  ;;  %2887 = vmatmul.msk.f32.vlgmr.msra.gmra.mxu2 %vm433_vm10, %v399_v43  ;;  %545 = vst.msk [vmem:[#allocation2 + $0x18] sm:$0xff] %vm543_vm11, %v2955_v44 }
  0xa6   : > { %546 = vst.msk [vmem:[#allocation2 + $0x30] sm:$0xff] %vm543_vm11, %v2955_v44 }
  0xa7   : > { %547 = vst.msk [vmem:[#allocation2 + $0x48] sm:$0xff] %vm543_vm11, %v2955_v44 }
  0xa8   : > { %1737 = vst.msk [vmem:[#allocation3] sm:$0xff] %vm543_vm11, %v2955_v44 }
  0xa9   : > { %1738 = vst.msk [vmem:[#allocation3 + $0x18] sm:$0xff] %vm543_vm11, %v2955_v44 }
  0xaa   : > { %1739 = vst.msk [vmem:[#allocation3 + $0x30] sm:$0xff] %vm543_vm11, %v2955_v44 }
  0xab   : > { %1740 = vst.msk [vmem:[#allocation3 + $0x48] sm:$0xff] %vm543_vm11, %v2955_v44 }
  0xac   : > { %2878 = vmatmul.msk.f32.gmra.mxu0 %vm433_vm10, %v400_v48  ;;  %549 = vst.msk [vmem:[#allocation2 + $0x10] sm:$0xff] %vm548_vm12, %v2955_v44 }
  0xad   : > { %2883 = vmatmul.msk.f32.gmra.mxu1 %vm433_vm10, %v400_v48  ;;  %2888 = vmatmul.msk.f32.gmra.mxu2 %vm433_vm10, %v400_v48  ;;  %550 = vst.msk [vmem:[#allocation2 + $0x28] sm:$0xff] %vm548_vm12, %v2955_v44 }
  0xae   : > { %551 = vst.msk [vmem:[#allocation2 + $0x40] sm:$0xff] %vm548_vm12, %v2955_v44 }
  0xaf   : > { %552 = vst.msk [vmem:[#allocation2 + $0x58] sm:$0xff] %vm548_vm12, %v2955_v44 }
  0xb0   : > { %1741 = vst.msk [vmem:[#allocation3 + $0x10] sm:$0xff] %vm548_vm12, %v2955_v44 }
  0xb1   : > { %1742 = vst.msk [vmem:[#allocation3 + $0x28] sm:$0xff] %vm548_vm12, %v2955_v44 }
  0xb2   : > { %1743 = vst.msk [vmem:[#allocation3 + $0x40] sm:$0xff] %vm548_vm12, %v2955_v44 }
  0xb3   : > { %1744 = vst.msk [vmem:[#allocation3 + $0x58] sm:$0xff] %vm548_vm12, %v2955_v44 }
  0xb4   : > { %2879 = vmatmul.msk.f32.gmra.mxu0 %vm433_vm10, %v401_v49 }
  0xb5   : > { %2884 = vmatmul.msk.f32.gmra.mxu1 %vm433_vm10, %v401_v49  ;;  %2889 = vmatmul.msk.f32.gmra.mxu2 %vm433_vm10, %v401_v49 }
  0xbc   : > { %2880 = vmatmul.msk.f32.gmra.mxu0 %vm433_vm10, %v402_v50 }
  0xbd   : > { %2885 = vmatmul.msk.f32.gmra.mxu1 %vm433_vm10, %v402_v50  ;;  %2890 = vmatmul.msk.f32.gmra.mxu2 %vm433_vm10, %v402_v50  ;;  %vm1463_vm10 = vcmask 261120  }
 0x121   : > { %v473_v53 = vpop.f32.mrf.mxu0 }
 0x122   : > { %v474_v54 = vadd.f32 %v473_v53, %v416_v52  ;;  %v502_v56 = vpop.f32.mrf.mxu1 }
 0x123   : > { %v503_v57 = vadd.f32 %v502_v56, %v416_v52 }
 0x124   : > { %v553_v59 = vmax.f32 %v474_v54, 0.0 }
 0x125   : > { %v554_v60 = vmax.f32 %v503_v57, 0.0 }
 0x126   : > { %v572_v61 = vmul.f32 %v3111_v55, %v553_v59 }
 0x127   : > { %v573_v62 = vmul.f32 %v3113_v58, %v554_v60 }
 0x128   : > { %v531_v0 = vpop.f32.mrf.mxu2  ;;  %596 = vrot.lane.b32.xlu1 %v572_v61, %s2954_s26 }
 0x129   : > { %v532_v1 = vadd.f32 %v531_v0, %v416_v52  ;;  %598 = vrot.lane.b32.xlu2 %v573_v62, %s2954_s26  ;;  %v476_v3 = vpop.f32.mrf.mxu0 }
 0x12a   : > { %v477_v4 = vadd.f32 %v476_v3, %v421_v63  ;;  %v505_v5 = vpop.f32.mrf.mxu1 }
 0x12b   : > { %v555_v6 = vmax.f32 %v532_v1, 0.0  ;;  %v506_v7 = vadd.f32 %v505_v5, %v421_v63 }
 0x12c   : > { %v556_v8 = vmax.f32 %v477_v4, 0.0 }
 0x12d   : > { %v574_v9 = vmul.f32 %v3118_v2, %v555_v6  ;;  %v557_v10 = vmax.f32 %v506_v7, 0.0 }
 0x12e   : > { %v575_v11 = vmul.f32 %v3111_v55, %v556_v8 }
 0x12f   : > { %v576_v13 = vmul.f32 %v3113_v58, %v557_v10  ;;  %600 = vrot.lane.b32.xlu0 %v574_v9, %s2954_s26 }
 0x130   : > { %v534_v15 = vpop.f32.mrf.mxu2  ;;  %602 = vrot.lane.b32.xlu1 %v575_v11, %s2954_s26 }
 0x131   : > { %v535_v16 = vadd.f32 %v534_v15, %v421_v63  ;;  %604 = vrot.lane.b32.xlu2 %v576_v13, %s2954_s26  ;;  %v479_v17 = vpop.f32.mrf.mxu0 }
 0x132   : > { %v480_v18 = vadd.f32 %v479_v17, %v426_v14  ;;  %v508_v19 = vpop.f32.mrf.mxu1 }
 0x133   : > { %v558_v20 = vmax.f32 %v535_v16, 0.0  ;;  %v509_v21 = vadd.f32 %v508_v19, %v426_v14 }
 0x134   : > { %v559_v22 = vmax.f32 %v480_v18, 0.0 }
 0x135   : > { %v577_v23 = vmul.f32 %v3118_v2, %v558_v20  ;;  %v560_v24 = vmax.f32 %v509_v21, 0.0 }
 0x136   : > { %v578_v25 = vmul.f32 %v3111_v55, %v559_v22 }
 0x137   : > { %v579_v26 = vmul.f32 %v3113_v58, %v560_v24  ;;  %606 = vrot.lane.b32.xlu0 %v577_v23, %s2954_s26 }
 0x138   : > { %v537_v27 = vpop.f32.mrf.mxu2  ;;  %608 = vrot.lane.b32.xlu1 %v578_v25, %s2954_s26 }
 0x139   : > { %v538_v29 = vadd.f32 %v537_v27, %v426_v14  ;;  %610 = vrot.lane.b32.xlu2 %v579_v26, %s2954_s26  ;;  %v482_v30 = vpop.f32.mrf.mxu0 }
 0x13a   : > { %v483_v31 = vadd.f32 %v482_v30, %v431_v28  ;;  %v511_v32 = vpop.f32.mrf.mxu1 }
 0x13b   : > { %v561_v33 = vmax.f32 %v538_v29, 0.0  ;;  %v512_v34 = vadd.f32 %v511_v32, %v431_v28 }
 0x13c   : > { %v562_v35 = vmax.f32 %v483_v31, 0.0 }
 0x13d   : > { %v580_v36 = vmul.f32 %v3118_v2, %v561_v33  ;;  %v563_v37 = vmax.f32 %v512_v34, 0.0 }
 0x13e   : > { %v581_v38 = vmul.f32 %v3111_v55, %v562_v35 }
 0x13f   : > { %v582_v39 = vmul.f32 %v3113_v58, %v563_v37  ;;  %612 = vrot.lane.b32.xlu0 %v580_v36, %s2954_s26 }
 0x140   : > { %v540_v40 = vpop.f32.mrf.mxu2  ;;  %614 = vrot.lane.b32.xlu1 %v581_v38, %s2954_s26 }
 0x141   : > { %v541_v41 = vadd.f32 %v540_v40, %v431_v28  ;;  %616 = vrot.lane.b32.xlu2 %v582_v39, %s2954_s26 }
 0x143   : > { %v564_v42 = vmax.f32 %v541_v41, 0.0 }
 0x145   : > { %v583_v43 = vmul.f32 %v3118_v2, %v564_v42 }
 0x147   : > { %618 = vrot.lane.b32.xlu0 %v583_v43, %s2954_s26 }
 0x183   : > { %v599_v45 = vpop.permute.xlu2 %598 }
 0x18b   : > { %v605_v48 = vpop.permute.xlu2 %604 }
 0x193   : > { %v611_v54 = vpop.permute.xlu2 %610 }
 0x19a   : > { %v597_v46 = vpop.permute.xlu1 %596 }
 0x19b   : > { %v3150_v47 = vsel %vm543_vm11, %v597_v46, %v599_v45  ;;  %641 = vst.msk [vmem:[#allocation2] sm:$0xff] %vm640_vm13, %v597_v46  ;;  %v617_v63 = vpop.permute.xlu2 %616 }
 0x19c   : > { %667 = vst [vmem:[#allocation4 + $0x8] sm:$0xff] %v3150_v47 }
 0x1a1   : > { %v601_v49 = vpop.permute.xlu0 %600 }
 0x1a2   : > { %v3154_v50 = vld [vmem:[#allocation2] sm:$0xff]  ;;  %v621_v51 = vsel %vm543_vm11, %v599_v45, %v601_v49  ;;  %v603_v52 = vpop.permute.xlu1 %602 }
 0x1a3   : > { %666 = vst [vmem:[#allocation4] sm:$0xff] %v3154_v50  ;;  %v3159_v53 = vsel %vm543_vm11, %v603_v52, %v605_v48  ;;  %1103 = vrot.lane.b32.xlu2 %v3154_v50, %s2952_s19  ;;  %863 = vrot.lane.b32.xlu0 %v3154_v50, %s2948_s15 }
 0x1a4   : > { %644 = vst.msk [vmem:[#allocation2 + $0x10] sm:$0xff] %vm643_vm14, %v621_v51  ;;  %703 = vrot.lane.b32.xlu1 %v3154_v50, %s2949_s16 }
 0x1a5   : > { %645 = vst.msk [vmem:[#allocation2 + $0x18] sm:$0xff] %vm640_vm13, %v603_v52 }
 0x1a6   : > { %646 = vst [vmem:[#allocation2 + $0x20] sm:$0xff] %v3159_v53 }
 0x1a9   : > { %v607_v56 = vpop.permute.xlu0 %606 }
 0x1aa   : > { %v623_v57 = vsel %vm543_vm11, %v605_v48, %v607_v56  ;;  %v609_v59 = vpop.permute.xlu1 %608 }
 0x1ab   : > { %v3171_v60 = vld [vmem:[#allocation2 + $0x10] sm:$0xff]  ;;  %647 = vst.msk [vmem:[#allocation2 + $0x28] sm:$0xff] %vm643_vm14, %v623_v57  ;;  %v3175_v61 = vsel %vm543_vm11, %v609_v59, %v611_v54  ;;  %1023 = vrot.lane.b32.xlu0 %v3154_v50, %s2950_s17  ;;  %705 = vrot.lane.b32.xlu2 %v3150_v47, %s2949_s16 }
 0x1ac   : > { %648 = vst.msk [vmem:[#allocation2 + $0x30] sm:$0xff] %vm640_vm13, %v609_v59  ;;  %783 = vrot.lane.b32.xlu1 %v3154_v50, %s2946_s13  ;;  %v3223_v9 = vld [vmem:[#allocation2 + $0x18] sm:$0xff] }
 0x1ad   : > { %649 = vst [vmem:[#allocation2 + $0x38] sm:$0xff] %v3175_v61 }
 0x1ae   : > { %669 = vst.msk [vmem:[#allocation4 + $0x10] sm:$0xff] %vm668_vm15, %v3171_v60 }
 0x1b1   : > { %v613_v62 = vpop.permute.xlu0 %612 }
 0x1b2   : > { %v625_v0 = vsel %vm543_vm11, %v611_v54, %v613_v62  ;;  %v615_v1 = vpop.permute.xlu1 %614  ;;  %v3188_v3 = vld [vmem:[#allocation2 + $0x28] sm:$0xff] }
 0x1b3   : > { %650 = vst.msk [vmem:[#allocation2 + $0x40] sm:$0xff] %vm643_vm14, %v625_v0  ;;  %v3192_v4 = vsel %vm543_vm11, %v615_v1, %v617_v63  ;;  %1105 = vrot.lane.b32.xlu0 %v3150_v47, %s2952_s19  ;;  %785 = vrot.lane.b32.xlu2 %v3150_v47, %s2946_s13  ;;  %v3255_v10 = vld [vmem:[#allocation2 + $0x30] sm:$0xff] }
 0x1b4   : > { %651 = vst.msk [vmem:[#allocation2 + $0x48] sm:$0xff] %vm640_vm13, %v615_v1  ;;  %1183 = vrot.lane.b32.xlu1 %v3154_v50, %s2951_s18 }
 0x1b5   : > { %652 = vst [vmem:[#allocation2 + $0x50] sm:$0xff] %v3192_v4 }
 0x1b6   : > { %672 = vst.msk [vmem:[#allocation4 + $0x28] sm:$0xff] %vm668_vm15, %v3188_v3 }
 0x1b9   : > { %v619_v5 = vpop.permute.xlu0 %618 }
 0x1ba   : > { %v627_v6 = vsel %vm543_vm11, %v617_v63, %v619_v5  ;;  %v662_v7 = vld [vmem:[#allocation2 + $0x40] sm:$0xff] }
 0x1bb   : > { %653 = vst.msk [vmem:[#allocation2 + $0x58] sm:$0xff] %vm643_vm14, %v627_v6  ;;  %707 = vrot.lane.b32.xlu0 %v3171_v60, %s2949_s16  ;;  %1185 = vrot.lane.b32.xlu2 %v3150_v47, %s2951_s18  ;;  %v3299_v18 = vld [vmem:[#allocation2 + $0x40] sm:$0xff]  ;;  %v3319_v22 = vld [vmem:[#allocation2 + $0x48] sm:$0xff] }
 0x1bc   : > { %865 = vrot.lane.b32.xlu1 %v3150_v47, %s2948_s15  ;;  %675 = vst.msk [vmem:[#allocation4 + $0x40] sm:$0xff] %vm668_vm15, %v662_v7 }
 0x1c2   : > { %v3213_v8 = vld [vmem:[#allocation2 + $0x58] sm:$0xff] }
 0x1c3   : > { %787 = vrot.lane.b32.xlu0 %v3171_v60, %s2946_s13  ;;  %1107 = vrot.lane.b32.xlu2 %v3171_v60, %s2952_s19  ;;  %678 = vst.msk [vmem:[#allocation4 + $0x58] sm:$0xff] %vm668_vm15, %v3213_v8 }
 0x1c4   : > { %1025 = vrot.lane.b32.xlu1 %v3150_v47, %s2950_s17 }
 0x1cb   : > { %867 = vrot.lane.b32.xlu0 %v3171_v60, %s2948_s15  ;;  %1189 = vrot.lane.b32.xlu2 %v3223_v9, %s2951_s18 }
 0x1cc   : > { %1187 = vrot.lane.b32.xlu1 %v3171_v60, %s2951_s18 }
 0x1d3   : > { %1109 = vrot.lane.b32.xlu2 %v3223_v9, %s2952_s19  ;;  %949 = vrot.lane.b32.xlu0 %v3223_v9, %s2947_s14 }
 0x1d4   : > { %709 = vrot.lane.b32.xlu1 %v3223_v9, %s2949_s16 }
 0x1db   : > { %1029 = vrot.lane.b32.xlu2 %v3223_v9, %s2950_s17  ;;  %1191 = vrot.lane.b32.xlu0 %v3159_v53, %s2951_s18 }
 0x1dc   : > { %789 = vrot.lane.b32.xlu1 %v3223_v9, %s2946_s13 }
 0x1e3   : > { %1111 = vrot.lane.b32.xlu0 %v3159_v53, %s2952_s19  ;;  %711 = vrot.lane.b32.xlu2 %v3159_v53, %s2949_s16 }
 0x1e4   : > { %869 = vrot.lane.b32.xlu1 %v3223_v9, %s2948_s15 }
 0x1eb   : > { %1031 = vrot.lane.b32.xlu0 %v3159_v53, %s2950_s17  ;;  %791 = vrot.lane.b32.xlu2 %v3159_v53, %s2946_s13 }
 0x1ec   : > { %951 = vrot.lane.b32.xlu1 %v3159_v53, %s2947_s14 }
 0x1f3   : > { %713 = vrot.lane.b32.xlu0 %v3188_v3, %s2949_s16  ;;  %871 = vrot.lane.b32.xlu2 %v3159_v53, %s2948_s15 }
 0x1f4   : > { %715 = vrot.lane.b32.xlu1 %v3255_v10, %s2949_s16 }
 0x1fb   : > { %793 = vrot.lane.b32.xlu0 %v3188_v3, %s2946_s13  ;;  %873 = vrot.lane.b32.xlu2 %v3188_v3, %s2948_s15 }
 0x1fc   : > { %795 = vrot.lane.b32.xlu1 %v3255_v10, %s2946_s13 }
 0x1fd   : > { %v3269_v11 = vpop.permute.xlu2 %1103 }
 0x203   : > { %1193 = vrot.lane.b32.xlu0 %v3188_v3, %s2951_s18  ;;  %1113 = vrot.lane.b32.xlu2 %v3188_v3, %s2952_s19 }
 0x204   : > { %1035 = vrot.lane.b32.xlu1 %v3255_v10, %s2950_s17 }
 0x205   : > { %v3277_v13 = vpop.permute.xlu2 %705 }
 0x20b   : > { %1195 = vrot.lane.b32.xlu0 %v3255_v10, %s2951_s18  ;;  %875 = vrot.lane.b32.xlu2 %v3255_v10, %s2948_s15 }
 0x20c   : > { %1197 = vrot.lane.b32.xlu1 %v3175_v61, %s2951_s18 }
 0x20d   : > { %v3285_v14 = vpop.permute.xlu2 %785 }
 0x213   : > { %955 = vrot.lane.b32.xlu0 %v3255_v10, %s2947_s14  ;;  %1115 = vrot.lane.b32.xlu2 %v3255_v10, %s2952_s19 }
 0x214   : > { %957 = vrot.lane.b32.xlu1 %v3175_v61, %s2947_s14 }
 0x215   : > { %v3293_v15 = vpop.permute.xlu0 %863  ;;  %v3295_v16 = vpop.permute.xlu2 %1185 }
 0x216   : > { %v3297_v17 = vpop.permute.xlu1 %703 }
 0x21b   : > { %877 = vrot.lane.b32.xlu0 %v3175_v61, %s2948_s15  ;;  %717 = vrot.lane.b32.xlu2 %v3175_v61, %s2949_s16 }
 0x21c   : > { %879 = vrot.lane.b32.xlu1 %v3299_v18, %s2948_s15 }
 0x21d   : > { %v3307_v19 = vpop.permute.xlu0 %1023  ;;  %v3309_v20 = vpop.permute.xlu2 %1107 }
 0x21e   : > { %4626 = vst [vmem:[#allocation10_spill] sm:$0xff] %v3309_v20  ;;  %v3313_v21 = vpop.permute.xlu1 %783 }
 0x21f   : > { %1149 = vst.msk [vmem:[#allocation4 + $0x250] sm:$0xff] %vm668_vm15, %v3309_v20  ;;  %v1440_v20 = vld [vmem:[%s4596_s4 + $0x8] sm:$0xff] }
 0x223   : > { %1117 = vrot.lane.b32.xlu0 %v3175_v61, %s2952_s19  ;;  %797 = vrot.lane.b32.xlu2 %v3175_v61, %s2946_s13 }
 0x224   : > { %721 = vrot.lane.b32.xlu1 %v3319_v22, %s2949_s16 }
 0x225   : > { %v3323_v23 = vpop.permute.xlu0 %1105  ;;  %v3325_v24 = vpop.permute.xlu2 %1189 }
 0x226   : > { %v3327_v25 = vpop.permute.xlu1 %1183 }
 0x22b   : > { %719 = vrot.lane.b32.xlu0 %v3299_v18, %s2949_s16  ;;  %1037 = vrot.lane.b32.xlu2 %v3175_v61, %s2950_s17 }
 0x22c   : > { %1201 = vrot.lane.b32.xlu1 %v3319_v22, %s2951_s18 }
 0x22d   : > { %v3335_v26 = vpop.permute.xlu0 %707  ;;  %v3337_v27 = vpop.permute.xlu2 %1109 }
 0x22e   : > { %4627 = vst [vmem:[#allocation11_spill] sm:$0xff] %v3335_v26  ;;  %v3341_v28 = vpop.permute.xlu1 %865 }
 0x22f   : > { %749 = vst.msk [vmem:[#allocation4 + $0x70] sm:$0xff] %vm668_vm15, %v3335_v26 }
 0x233   : > { %1199 = vrot.lane.b32.xlu2 %v3299_v18, %s2951_s18  ;;  %881 = vrot.lane.b32.xlu0 %v3319_v22, %s2948_s15 }
 0x234   : > { %883 = vrot.lane.b32.xlu1 %v3192_v4, %s2948_s15 }
 0x235   : > { %v3349_v29 = vpop.permute.xlu0 %787  ;;  %v3351_v30 = vpop.permute.xlu2 %1029 }
 0x236   : > { %4628 = vst [vmem:[#allocation12_spill] sm:$0xff] %v3349_v29  ;;  %v3355_v31 = vpop.permute.xlu1 %1025 }
 0x237   : > { %829 = vst.msk [vmem:[#allocation4 + $0xd0] sm:$0xff] %vm668_vm15, %v3349_v29 }
 0x23b   : > { %799 = vrot.lane.b32.xlu2 %v3299_v18, %s2946_s13  ;;  %1121 = vrot.lane.b32.xlu0 %v3319_v22, %s2952_s19 }
 0x23c   : > { %945 = vrot.lane.b32.xlu1 %v3150_v47, %s2947_s14 }
 0x23d   : > { %v3363_v32 = vpop.permute.xlu0 %867  ;;  %v3365_v33 = vpop.permute.xlu2 %711 }
 0x23e   : > { %909 = vst.msk [vmem:[#allocation4 + $0x130] sm:$0xff] %vm668_vm15, %v3363_v32  ;;  %v3369_v34 = vpop.permute.xlu1 %1187 }
 0x23f   : > { %1229 = vst.msk [vmem:[#allocation4 + $0x2b0] sm:$0xff] %vm668_vm15, %v3369_v34 }
 0x243   : > { %1119 = vrot.lane.b32.xlu2 %v3299_v18, %s2952_s19  ;;  %1041 = vrot.lane.b32.xlu0 %v3319_v22, %s2950_s17 }
 0x244   : > { %1033 = vrot.lane.b32.xlu1 %v3188_v3, %s2950_s17 }
 0x245   : > { %v3379_v35 = vpop.permute.xlu0 %949  ;;  %v3381_v36 = vpop.permute.xlu2 %791 }
 0x246   : > { %v3383_v37 = vpop.permute.xlu1 %709 }
 0x24b   : > { %961 = vrot.lane.b32.xlu0 %v3319_v22, %s2947_s14  ;;  %801 = vrot.lane.b32.xlu2 %v3319_v22, %s2946_s13 }
 0x24c   : > { %1123 = vrot.lane.b32.xlu1 %v3192_v4, %s2952_s19 }
 0x24d   : > { %v3391_v38 = vpop.permute.xlu0 %1191  ;;  %v3393_v39 = vpop.permute.xlu2 %871 }
 0x24e   : > { %v3395_v40 = vpop.permute.xlu1 %789 }
 0x253   : > { %803 = vrot.lane.b32.xlu0 %v3192_v4, %s2946_s13  ;;  %723 = vrot.lane.b32.xlu2 %v3192_v4, %s2949_s16 }
 0x254   : > { %1043 = vrot.lane.b32.xlu1 %v3192_v4, %s2950_s17 }
 0x255   : > { %v3403_v41 = vpop.permute.xlu0 %1111  ;;  %v3405_v42 = vpop.permute.xlu2 %873 }
 0x256   : > { %912 = vst.msk [vmem:[#allocation4 + $0x148] sm:$0xff] %vm668_vm15, %v3405_v42  ;;  %v3409_v43 = vpop.permute.xlu1 %869 }
 0x25b   : > { %943 = vrot.lane.b32.xlu0 %v3154_v50, %s2947_s14  ;;  %1027 = vrot.lane.b32.xlu2 %v3171_v60, %s2950_s17 }
 0x25c   : > { %963 = vrot.lane.b32.xlu1 %v3192_v4, %s2947_s14 }
 0x25d   : > { %v3417_v44 = vpop.permute.xlu0 %1031  ;;  %v3419_v45 = vpop.permute.xlu2 %1113 }
 0x25e   : > { %4629 = vst [vmem:[#allocation13_spill] sm:$0xff] %v3419_v45  ;;  %v3423_v46 = vpop.permute.xlu1 %951 }
 0x25f   : > { %1152 = vst.msk [vmem:[#allocation4 + $0x268] sm:$0xff] %vm668_vm15, %v3419_v45 }
 0x263   : > { %1039 = vrot.lane.b32.xlu0 %v3299_v18, %s2950_s17  ;;  %1203 = vrot.lane.b32.xlu2 %v3192_v4, %s2951_s18 }
 0x264   : > { %885 = vrot.lane.b32.xlu1 %v3213_v8, %s2948_s15 }
 0x265   : > { %v3431_v48 = vpop.permute.xlu0 %713  ;;  %v3433_v49 = vpop.permute.xlu2 %875 }
 0x266   : > { %4630 = vst [vmem:[#allocation14_spill] sm:$0xff] %v3431_v48  ;;  %v3437_v51 = vpop.permute.xlu1 %715 }
 0x267   : > { %752 = vst.msk [vmem:[#allocation4 + $0x88] sm:$0xff] %vm668_vm15, %v3431_v48 }
 0x26b   : > { %725 = vrot.lane.b32.xlu0 %v3213_v8, %s2949_s16  ;;  %1281 = vrot.lane.b32.xlu2 %v3319_v22, %s2945_s12 }
 0x26c   : > { %1205 = vrot.lane.b32.xlu1 %v3213_v8, %s2951_s18 }
 0x26d   : > { %v3445_v52 = vpop.permute.xlu0 %793  ;;  %v3447_v54 = vpop.permute.xlu2 %1115 }
 0x26e   : > { %4631 = vst [vmem:[#allocation15_spill] sm:$0xff] %v3445_v52  ;;  %v3451_v56 = vpop.permute.xlu1 %795 }
 0x26f   : > { %832 = vst.msk [vmem:[#allocation4 + $0xe8] sm:$0xff] %vm668_vm15, %v3445_v52 }
 0x273   : > { %1283 = vrot.lane.b32.xlu0 %v3192_v4, %s2945_s12  ;;  %1275 = vrot.lane.b32.xlu2 %v3255_v10, %s2945_s12 }
 0x274   : > { %805 = vrot.lane.b32.xlu1 %v3213_v8, %s2946_s13 }
 0x275   : > { %v3459_v57 = vpop.permute.xlu0 %1193  ;;  %v3461_v59 = vpop.permute.xlu2 %717 }
 0x276   : > { %1232 = vst.msk [vmem:[#allocation4 + $0x2c8] sm:$0xff] %vm668_vm15, %v3459_v57  ;;  %v3465_v62 = vpop.permute.xlu1 %1035 }
 0x27b   : > { %1277 = vrot.lane.b32.xlu0 %v3175_v61, %s2945_s12  ;;  %1125 = vrot.lane.b32.xlu2 %v3213_v8, %s2952_s19 }
 0x27c   : > { %959 = vrot.lane.b32.xlu1 %v3299_v18, %s2947_s14 }
 0x27d   : > { %v3473_v63 = vpop.permute.xlu0 %1195  ;;  %v3475_v0 = vpop.permute.xlu2 %797 }
 0x27e   : > { %v3477_v1 = vpop.permute.xlu1 %1197 }
 0x283   : > { %965 = vrot.lane.b32.xlu0 %v3213_v8, %s2947_s14  ;;  %1045 = vrot.lane.b32.xlu2 %v3213_v8, %s2950_s17 }
 0x284   : > { %953 = vrot.lane.b32.xlu1 %v3188_v3, %s2947_s14 }
 0x285   : > { %v3485_v61 = vpop.permute.xlu0 %955  ;;  %v3487_v4 = vpop.permute.xlu2 %1037 }
 0x286   : > { %v3489_v5 = vpop.permute.xlu1 %957 }
 0x28b   : > { %1271 = vrot.lane.b32.xlu0 %v3159_v53, %s2945_s12  ;;  %1269 = vrot.lane.b32.xlu2 %v3223_v9, %s2945_s12 }
 0x28c   : > { %947 = vrot.lane.b32.xlu1 %v3171_v60, %s2947_s14 }
 0x28d   : > { %v3497_v6 = vpop.permute.xlu0 %877  ;;  %v3499_v7 = vpop.permute.xlu2 %1199 }
 0x28e   : > { %1235 = vst.msk [vmem:[#allocation4 + $0x2e0] sm:$0xff] %vm668_vm15, %v3499_v7  ;;  %v3503_v12 = vpop.permute.xlu1 %879  ;;  %v891_v29 = vsel %vm338_vm5, %v3433_v49, %v3497_v6 }
 0x28f   : > { %915 = vst.msk [vmem:[#allocation4 + $0x160] sm:$0xff] %vm668_vm15, %v3503_v12 }
 0x293   : > { %1285 = vrot.lane.b32.xlu0 %v3213_v8, %s2945_s12  ;;  %1265 = vrot.lane.b32.xlu2 %v3150_v47, %s2945_s12 }
 0x294   : > { %1263 = vrot.lane.b32.xlu1 %v3154_v50, %s2945_s12 }
 0x295   : > { %v3513_v53 = vpop.permute.xlu0 %1117  ;;  %v3515_v2 = vpop.permute.xlu2 %799 }
 0x296   : > { %835 = vst.msk [vmem:[#allocation4 + $0x100] sm:$0xff] %vm668_vm15, %v3515_v2  ;;  %v3519_v58 = vpop.permute.xlu1 %721 }
 0x29b   : > { %1267 = vrot.lane.b32.xlu0 %v3171_v60, %s2945_s12  ;;  %1273 = vrot.lane.b32.xlu2 %v3188_v3, %s2945_s12  ;;  %v1441_v60 = vld [vmem:[%s4596_s4 + $0x10] sm:$0xff]  ;;  %v1442_v3 = vld [vmem:[%s4596_s4 + $0x18] sm:$0xff] }
 0x29c   : > { %1279 = vrot.lane.b32.xlu1 %v3299_v18, %s2945_s12  ;;  %v1439_v18 = vld [vmem:[%s4596_s4] sm:$0xff] }
 0x29d   : > { %v3527_v47 = vpop.permute.xlu0 %719  ;;  %v3529_v50 = vpop.permute.xlu2 %1119 }
 0x29e   : > { %4632 = vst [vmem:[#allocation16_spill] sm:$0xff] %v3527_v47  ;;  %v1202_v8 = vpop.permute.xlu1 %1201 }
 0x29f   : > { %755 = vst.msk [vmem:[#allocation4 + $0xa0] sm:$0xff] %vm668_vm15, %v3527_v47 }
 0x2a0   : > { %1155 = vst.msk [vmem:[#allocation4 + $0x280] sm:$0xff] %vm668_vm15, %v3529_v50 }
 0x2a3   : > { %1455 = vperm.xlu0 %2929, %v1441_v60   ;;  %1460 = vperm.xlu2 %2928, %v1442_v3   ;;  %v889_v60 = vsel %vm338_vm5, %v3409_v43, %v3393_v39 }
 0x2a4   : > { %1445 = vperm.xlu1 %2930, %v1439_v18  }
 0x2a5   : > { %v882_v55 = vpop.permute.xlu0 %881  ;;  %v802_v26 = vpop.permute.xlu2 %801 }
 0x2a6   : > { %v3544_v48 = vpop.permute.xlu1 %883 }
 0x2a7   : > { %v893_v47 = vsel %vm338_vm5, %v882_v55, %v3544_v48  ;;  %v887_v55 = vsel %vm338_vm5, %v3293_v15, %v3341_v28 }
 0x2a8   : > { %1476 = vmatpush.msra.mxu3 %v893_v47 }
 0x2aa   : > { %1477 = vmatpush.msra.mxu3 %v891_v29 }
 0x2ac   : > { %1450 = vperm.xlu1 %2930, %v1440_v20   ;;  %1478 = vmatpush.msra.mxu3 %v889_v60 }
 0x2ad   : > { %v1122_v47 = vpop.permute.xlu0 %1121  ;;  %v3560_v3 = vpop.permute.xlu2 %723 }
 0x2ae   : > { %v3562_v18 = vpop.permute.xlu1 %945  ;;  %1479 = vmatpush.msra.mxu3 %v887_v55  ;;  %v1211_v55 = vsel %vm382_vm8, %v3473_v63, %v3477_v1 }
 0x2b5   : > { %v1042_v49 = vpop.permute.xlu0 %1041  ;;  %v3564_v52 = vpop.permute.xlu2 %1027 }
 0x2b6   : > { %4633 = vst [vmem:[#allocation17_spill] sm:$0xff] %v3564_v52  ;;  %v3568_v29 = vpop.permute.xlu1 %1033 }
 0x2b7   : > { %1069 = vst.msk [vmem:[#allocation4 + $0x1f0] sm:$0xff] %vm668_vm15, %v3564_v52  ;;  %v1209_v52 = vsel %vm382_vm8, %v3325_v24, %v3391_v38  ;;  %v811_v24 = vsel %vm327_vm4, %v3451_v56, %v3475_v0  ;;  %v807_v56 = vsel %vm327_vm4, %v3313_v21, %v3285_v14  ;;  %v1051_v21 = vsel %vm360_vm2, %v3465_v62, %v3487_v4 }
 0x2b8   : > { %4634 = vst [vmem:[#allocation18_spill] sm:$0xff] %v3568_v29  ;;  %v1047_v62 = vsel %vm360_vm2, %v3307_v19, %v3355_v31  ;;  %v971_v19 = vsel %vm349_vm0, %v3485_v61, %v3489_v5  ;;  %v3670_v61 = vld [vmem:[%s4595_s3] sm:$0xff] }
 0x2b9   : > { %1072 = vst.msk [vmem:[#allocation4 + $0x208] sm:$0xff] %vm668_vm15, %v3568_v29  ;;  %v1207_v29 = vsel %vm382_vm8, %v3327_v25, %v3295_v16  ;;  %v1131_v25 = vsel %vm371_vm9, %v3447_v54, %v3513_v53  ;;  %v1127_v54 = vsel %vm371_vm9, %v3269_v11, %v3323_v23  ;;  %v731_v11 = vsel %vm316_vm6, %v3437_v51, %v3461_v59 }
 0x2ba   : > { %v727_v51 = vsel %vm316_vm6, %v3297_v17, %v3277_v13 }
 0x2bd   : > { %v962_v20 = vpop.permute.xlu0 %961  ;;  %v3572_v43 = vpop.permute.xlu2 %1203 }
 0x2be   : > { %v1213_v15 = vsel %vm382_vm8, %v1202_v8, %v3572_v43  ;;  %v3576_v60 = vpop.permute.xlu1 %1123 }
 0x2bf   : > { %1505 = vmatpush.msrb.mxu0 %v1213_v15  ;;  %v1133_v15 = vsel %vm371_vm9, %v1122_v47, %v3576_v60 }
 0x2c1   : > { %1506 = vmatpush.msrb.mxu0 %v1211_v55 }
 0x2c3   : > { %1507 = vmatpush.msrb.mxu0 %v1209_v52  ;;  %v809_v52 = vsel %vm327_vm4, %v3395_v40, %v3381_v36  ;;  %v733_v40 = vsel %vm316_vm6, %v3519_v58, %v3560_v3  ;;  %v729_v58 = vsel %vm316_vm6, %v3383_v37, %v3365_v33 }
 0x2c5   : > { %v3587_v45 = vpop.permute.xlu0 %803  ;;  %v3589_v8 = vpop.permute.xlu2 %1281  ;;  %1508 = vmatpush.msrb.mxu0 %v1207_v29 }
 0x2c6   : > { %v813_v63 = vsel %vm327_vm4, %v802_v26, %v3587_v45  ;;  %v3595_v55 = vpop.permute.xlu1 %1043  ;;  %v1129_v26 = vsel %vm371_vm9, %v3337_v27, %v3403_v41 }
 0x2c7   : > { %1480 = vmatpush.msra.mxu3 %v813_v63  ;;  %1509 = vmatpush.msrb.mxu0 %v1133_v15  ;;  %v1053_v27 = vsel %vm360_vm2, %v1042_v49, %v3595_v55  ;;  %v1049_v49 = vsel %vm360_vm2, %v3351_v30, %v3417_v44 }
 0x2c9   : > { %1481 = vmatpush.msra.mxu3 %v811_v24  ;;  %1510 = vmatpush.msrb.mxu0 %v1131_v25 }
 0x2cb   : > { %1482 = vmatpush.msra.mxu3 %v809_v52  ;;  %1511 = vmatpush.msrb.mxu0 %v1129_v26  ;;  %v3698_v52 = vld [vmem:[%s4595_s3 + $0x18] sm:$0xff] }
 0x2cd   : > { %v944_v47 = vpop.permute.xlu0 %943  ;;  %v3615_v29 = vpop.permute.xlu2 %1275  ;;  %1483 = vmatpush.msra.mxu3 %v807_v56  ;;  %1512 = vmatpush.msrb.mxu0 %v1127_v54  ;;  %v4636_v54 = vld [vmem:[#allocation15_spill] sm:$0xff] }
 0x2ce   : > { %v3622_v15 = vpop.permute.xlu1 %963 }
 0x2cf   : > { %1484 = vmatpush.msra.mxu3 %v733_v40  ;;  %1513 = vmatpush.msrb.mxu0 %v1053_v27  ;;  %v973_v37 = vsel %vm349_vm0, %v962_v20, %v3622_v15  ;;  %v892_v20 = vsel %vm338_vm5, %v3497_v6, %v3503_v12  ;;  %v967_v12 = vsel %vm349_vm0, %v944_v47, %v3562_v18 }
 0x2d0   : > { %v810_v47 = vsel %vm327_vm4, %v3381_v36, %v4636_v54 }
 0x2d1   : > { %1485 = vmatpush.msra.mxu3 %v731_v11  ;;  %1514 = vmatpush.msrb.mxu0 %v1051_v21  ;;  %v3755_v21 = vld [vmem:[%s4595_s3 + $0x38] sm:$0xff] }
 0x2d3   : > { %1486 = vmatpush.msra.mxu3 %v729_v58  ;;  %1515 = vmatpush.msrb.mxu0 %v1049_v49 }
 0x2d5   : > { %v3642_v63 = vpop.permute.xlu0 %1039  ;;  %v1126_v24 = vpop.permute.xlu2 %1125  ;;  %1487 = vmatpush.msra.mxu3 %v727_v51  ;;  %1516 = vmatpush.msrb.mxu0 %v1047_v62  ;;  %v4641_v51 = vld [vmem:[#allocation18_spill] sm:$0xff] }
 0x2d6   : > { %1075 = vst.msk [vmem:[#allocation4 + $0x220] sm:$0xff] %vm668_vm15, %v3642_v63  ;;  %v886_v30 = vpop.permute.xlu1 %885  ;;  %v1052_v49 = vsel %vm360_vm2, %v3487_v4, %v3642_v63  ;;  %v1050_v62 = vsel %vm360_vm2, %v3417_v44, %v4641_v51  ;;  %v4642_v4 = vld [vmem:[#allocation11_spill] sm:$0xff] }
 0x2d7   : > { %1158 = vst.msk [vmem:[#allocation4 + $0x298] sm:$0xff] %vm668_vm15, %v1126_v24  ;;  %v894_v17 = vsel %vm338_vm5, %v3544_v48, %v886_v30  ;;  %1488 = vmatpush.msra.mxu3 %v3319_v22  ;;  %1517 = vmatpush.msrb.mxu0 %v973_v37  ;;  %v969_v48 = vsel %vm349_vm0, %v3379_v35, %v3423_v46  ;;  %v3677_v35 = vld [vmem:[%s4595_s3 + $0x8] sm:$0xff] }
 0x2d8   : > { %918 = vst.msk [vmem:[#allocation4 + $0x178] sm:$0xff] %vm668_vm15, %v886_v30  ;;  %1563 = vmatpush.msrb.mxu2 %v894_v17  ;;  %v890_v22 = vsel %vm338_vm5, %v3393_v39, %v3405_v42  ;;  %v728_v63 = vsel %vm316_vm6, %v3277_v13, %v4642_v4  ;;  %v664_v13 = vld [vmem:[#allocation2 + $0x50] sm:$0xff] }
 0x2d9   : > { %1489 = vmatpush.msra.mxu3 %v3255_v10  ;;  %1518 = vmatpush.msrb.mxu0 %v971_v19  ;;  %v1331_v10 = vld [vmem:[#allocation4] sm:$0xff]  ;;  %v3795_v19 = vld [vmem:[%s4595_s3 + $0x50] sm:$0xff] }
 0x2da   : > { %1564 = vmatpush.msrb.mxu2 %v892_v20 }
 0x2db   : > { %1490 = vmatpush.msra.mxu3 %v3223_v9  ;;  %1519 = vmatpush.msrb.mxu0 %v969_v48  ;;  %v888_v9 = vsel %vm338_vm5, %v3341_v28, %v3363_v32  ;;  %v1212_v28 = vsel %vm382_vm8, %v3477_v1, %v3499_v7  ;;  %v1210_v32 = vsel %vm382_vm8, %v3391_v38, %v3459_v57  ;;  %v3713_v38 = vld [vmem:[%s4595_s3 + $0x20] sm:$0xff] }
 0x2dc   : > { %1565 = vmatpush.msrb.mxu2 %v890_v22  ;;  %v1134_v57 = vsel %vm371_vm9, %v3576_v60, %v1126_v24  ;;  %v4643_v24 = vld [vmem:[#allocation17_spill] sm:$0xff] }
 0x2dd   : > { %v726_v39 = vpop.permute.xlu0 %725  ;;  %v1046_v42 = vpop.permute.xlu2 %1045  ;;  %1491 = vmatpush.msra.mxu3 %v1331_v10  ;;  %1520 = vmatpush.msrb.mxu0 %v967_v12  ;;  %v1048_v37 = vsel %vm360_vm2, %v3355_v31, %v4643_v24  ;;  %v658_v48 = vld [vmem:[#allocation2 + $0x20] sm:$0xff]  ;;  %v1332_v12 = vld [vmem:[#allocation4 + $0x8] sm:$0xff] }
 0x2de   : > { %758 = vst.msk [vmem:[#allocation4 + $0xb8] sm:$0xff] %vm668_vm15, %v726_v39  ;;  %v1206_v6 = vpop.permute.xlu1 %1205  ;;  %1566 = vmatpush.msrb.mxu2 %v888_v9  ;;  %1492 = vmatmul.f32.vlgmr.msra.gmra.mxu3 %v3670_v61 }
 0x2df   : > { %1078 = vst.msk [vmem:[#allocation4 + $0x238] sm:$0xff] %vm668_vm15, %v1046_v42  ;;  %v1214_v25 = vsel %vm382_vm8, %v3572_v43, %v1206_v6  ;;  %1521 = vmatmul.f32.vlgmr.msrb.gmra.mxu0 %v3677_v35  ;;  %v1208_v43 = vsel %vm382_vm8, %v3295_v16, %v3369_v34  ;;  %v812_v34 = vsel %vm327_vm4, %v3475_v0, %v3515_v2  ;;  %v3737_v2 = vld [vmem:[%s4595_s3 + $0x30] sm:$0xff]  ;;  %v4637_v0 = vld [vmem:[#allocation10_spill] sm:$0xff] }
 0x2e0   : > { %1238 = vst.msk [vmem:[#allocation4 + $0x2f8] sm:$0xff] %vm668_vm15, %v1206_v6  ;;  %1592 = vmatpush.msrb.mxu3 %v1214_v25  ;;  %v1417_v25 = vld [vmem:[#allocation4 + $0x2b0] sm:$0xff] }
 0x2e2   : > { %1593 = vmatpush.msrb.mxu3 %v1212_v28 }
 0x2e4   : > { %1594 = vmatpush.msrb.mxu3 %v1210_v32  ;;  %v3822_v32 = vld [vmem:[%s4595_s3 + $0x10] sm:$0xff] }
 0x2e5   : > { %v3703_v26 = vpop.permute.xlu0 %1283  ;;  %v3705_v56 = vpop.permute.xlu2 %1269 }
 0x2e6   : > { %v1293_v1 = vsel %vm393_vm3, %v3589_v8, %v3703_v26  ;;  %v806_v7 = vpop.permute.xlu1 %805  ;;  %1595 = vmatpush.msrb.mxu3 %v1208_v43  ;;  %v1132_v8 = vsel %vm371_vm9, %v3513_v53, %v3529_v50  ;;  %v1128_v53 = vsel %vm371_vm9, %v3323_v23, %v4637_v0  ;;  %v4638_v50 = vld [vmem:[#allocation12_spill] sm:$0xff]  ;;  %v734_v23 = vsel %vm316_vm6, %v3560_v3, %v726_v39  ;;  %v4640_v3 = vld [vmem:[#allocation14_spill] sm:$0xff] }
 0x2e7   : > { %v814_v16 = vsel %vm327_vm4, %v3587_v45, %v806_v7  ;;  %838 = vst.msk [vmem:[#allocation4 + $0x118] sm:$0xff] %vm668_vm15, %v806_v7  ;;  %1495 = vmatmul.f32.gmra.mxu3 %v3698_v52  ;;  %1546 = vmatpush.msrb.mxu1 %v1293_v1  ;;  %v4635_v45 = vld [vmem:[#allocation13_spill] sm:$0xff]  ;;  %v808_v40 = vsel %vm327_vm4, %v3285_v14, %v4638_v50  ;;  %v3837_v0 = vld [vmem:[%s4595_s3 + $0x28] sm:$0xff] }
 0x2e8   : > { %1567 = vmatpush.msrb.mxu2 %v814_v16  ;;  %1596 = vmatpush.msrb.mxu3 %v1134_v57  ;;  %v1130_v60 = vsel %vm371_vm9, %v3403_v41, %v4635_v45  ;;  %v1054_v14 = vsel %vm360_vm2, %v3595_v55, %v1046_v42  ;;  %v730_v55 = vsel %vm316_vm6, %v3365_v33, %v4640_v3  ;;  %v1423_v39 = vld [vmem:[#allocation4 + $0x2e0] sm:$0xff]  ;;  %v1420_v42 = vld [vmem:[#allocation4 + $0x2c8] sm:$0xff] }
 0x2e9   : > { %1524 = vmatmul.f32.gmra.mxu0 %v3713_v38  ;;  %v1411_v1 = vld [vmem:[#allocation4 + $0x280] sm:$0xff]  ;;  %v1408_v57 = vld [vmem:[#allocation4 + $0x268] sm:$0xff] }
 0x2ea   : > { %1568 = vmatpush.msrb.mxu2 %v812_v34  ;;  %1597 = vmatpush.msrb.mxu3 %v1132_v8  ;;  %v1375_v7 = vld [vmem:[#allocation4 + $0x160] sm:$0xff]  ;;  %v1372_v8 = vld [vmem:[#allocation4 + $0x148] sm:$0xff] }
 0x2eb   : > { %v1327_v3 = vld [vmem:[%s4595_s3 + $0x40] sm:$0xff] }
 0x2ec   : > { %1569 = vmatpush.msrb.mxu2 %v810_v47  ;;  %1598 = vmatpush.msrb.mxu3 %v1130_v60  ;;  %v1405_v60 = vld [vmem:[#allocation4 + $0x250] sm:$0xff] }
 0x2ed   : > { %v3745_v41 = vpop.permute.xlu0 %1277  ;;  %v3747_v27 = vpop.permute.xlu2 %1265  ;;  %v1369_v47 = vld [vmem:[#allocation4 + $0x130] sm:$0xff] }
 0x2ee   : > { %v1291_v36 = vsel %vm393_vm3, %v3615_v29, %v3745_v41  ;;  %v960_v11 = vpop.permute.xlu1 %959  ;;  %1570 = vmatpush.msrb.mxu2 %v808_v40  ;;  %1599 = vmatpush.msrb.mxu3 %v1128_v53  ;;  %v4639_v29 = vld [vmem:[#allocation16_spill] sm:$0xff]  ;;  %v1399_v40 = vld [vmem:[#allocation4 + $0x220] sm:$0xff] }
 0x2ef   : > { %995 = vst.msk [vmem:[#allocation4 + $0x1c0] sm:$0xff] %vm668_vm15, %v960_v11  ;;  %1498 = vmatmul.f32.gmra.mxu3 %v3737_v2  ;;  %1547 = vmatpush.msrb.mxu1 %v1291_v36  ;;  %v732_v58 = vsel %vm316_vm6, %v3461_v59, %v4639_v29  ;;  %v3779_v59 = vld [vmem:[%s4595_s3 + $0x48] sm:$0xff]  ;;  %v972_v31 = vsel %vm349_vm0, %v3489_v5, %v960_v11  ;;  %v1402_v53 = vld [vmem:[#allocation4 + $0x238] sm:$0xff]  ;;  %v1363_v36 = vld [vmem:[#allocation4 + $0x100] sm:$0xff] }
 0x2f0   : > { %1571 = vmatpush.msrb.mxu2 %v734_v23  ;;  %1600 = vmatpush.msrb.mxu3 %v1054_v14  ;;  %v1366_v50 = vld [vmem:[#allocation4 + $0x118] sm:$0xff]  ;;  %v1396_v11 = vld [vmem:[#allocation4 + $0x208] sm:$0xff] }
 0x2f1   : > { %1527 = vmatmul.f32.gmra.mxu0 %v3755_v21  ;;  %v1360_v29 = vld [vmem:[#allocation4 + $0xe8] sm:$0xff] }
 0x2f2   : > { %1572 = vmatpush.msrb.mxu2 %v732_v58  ;;  %1601 = vmatpush.msrb.mxu3 %v1052_v49  ;;  %v1393_v58 = vld [vmem:[#allocation4 + $0x1f0] sm:$0xff] }
 0x2f4   : > { %1573 = vmatpush.msrb.mxu2 %v730_v55  ;;  %1602 = vmatpush.msrb.mxu3 %v1050_v62  ;;  %v1354_v62 = vld [vmem:[#allocation4 + $0xb8] sm:$0xff] }
 0x2f5   : > { %v966_v33 = vpop.permute.xlu0 %965  ;;  %v3787_v30 = vpop.permute.xlu2 %1273 }
 0x2f6   : > { %v974_v44 = vsel %vm349_vm0, %v3622_v15, %v966_v33  ;;  %998 = vst.msk [vmem:[#allocation4 + $0x1d8] sm:$0xff] %vm668_vm15, %v966_v33  ;;  %v954_v17 = vpop.permute.xlu1 %953  ;;  %1574 = vmatpush.msrb.mxu2 %v728_v63  ;;  %1603 = vmatpush.msrb.mxu3 %v1048_v37  ;;  %v661_v15 = vld [vmem:[#allocation2 + $0x38] sm:$0xff]  ;;  %v1387_v4 = vld [vmem:[#allocation4 + $0x1c0] sm:$0xff]  ;;  %v1348_v37 = vld [vmem:[#allocation4 + $0x88] sm:$0xff] }
 0x2f7   : > { %1312 = vst.msk [vmem:[#allocation4 + $0x328] sm:$0xff] %vm668_vm15, %v3787_v30  ;;  %1501 = vmatmul.f32.gmra.mxu3 %v3779_v59  ;;  %v970_v20 = vsel %vm349_vm0, %v3423_v46, %v954_v17  ;;  %v1426_v46 = vld [vmem:[#allocation4 + $0x2f8] sm:$0xff]  ;;  %v1351_v63 = vld [vmem:[#allocation4 + $0xa0] sm:$0xff] }
 0x2f8   : > { %992 = vst.msk [vmem:[#allocation4 + $0x1a8] sm:$0xff] %vm668_vm15, %v954_v17  ;;  %1575 = vmatpush.msrb.mxu2 %v664_v13  ;;  %1604 = vmatpush.msrb.mxu3 %v974_v44  ;;  %v1345_v44 = vld [vmem:[#allocation4 + $0x70] sm:$0xff]  ;;  %v1342_v17 = vld [vmem:[#allocation4 + $0x58] sm:$0xff]  ;;  %v1339_v13 = vld [vmem:[#allocation4 + $0x40] sm:$0xff] }
 0x2f9   : > { %1530 = vmatmul.f32.gmra.mxu0 %v3795_v19 }
 0x2fa   : > { %1576 = vmatpush.msrb.mxu2 %v661_v15  ;;  %1605 = vmatpush.msrb.mxu3 %v972_v31  ;;  %v1336_v31 = vld [vmem:[#allocation4 + $0x28] sm:$0xff]  ;;  %v1333_v15 = vld [vmem:[#allocation4 + $0x10] sm:$0xff] }
 0x2fc   : > { %1577 = vmatpush.msrb.mxu2 %v658_v48  ;;  %1606 = vmatpush.msrb.mxu3 %v970_v20 }
 0x2fd   : > { %v3806_v22 = vpop.permute.xlu0 %1271  ;;  %v1390_v55 = vld [vmem:[#allocation4 + $0x1d8] sm:$0xff] }
 0x2fe   : > { %v1289_v10 = vsel %vm393_vm3, %v3705_v56, %v3806_v22  ;;  %v948_v9 = vpop.permute.xlu1 %947  ;;  %1578 = vmatpush.msrb.mxu2 %v1332_v12  ;;  %v1414_v56 = vld [vmem:[#allocation4 + $0x298] sm:$0xff]  ;;  %v1432_v49 = vld [vmem:[#allocation4 + $0x328] sm:$0xff] }
 0x2ff   : > { %v968_v5 = vsel %vm349_vm0, %v3562_v18, %v948_v9  ;;  %989 = vst.msk [vmem:[#allocation4 + $0x190] sm:$0xff] %vm668_vm15, %v948_v9  ;;  %1579 = vmatmul.f32.vlgmr.msrb.gmra.mxu2 %v3670_v61  ;;  %1548 = vmatpush.msrb.mxu1 %v1289_v10  ;;  %v1384_v24 = vld [vmem:[#allocation4 + $0x1a8] sm:$0xff] }
 0x300   : > { %1679 = vmatpush.msra.mxu2 %v1426_v46  ;;  %1607 = vmatpush.msrb.mxu3 %v968_v5 }
 0x301   : > { %1608 = vmatmul.f32.vlgmr.msrb.gmra.mxu3 %v3677_v35 }
 0x302   : > { %1680 = vmatpush.msra.mxu2 %v1423_v39 }
 0x304   : > { %1681 = vmatpush.msra.mxu2 %v1420_v42 }
 0x305   : > { %v1286_v6 = vpop.permute.xlu0 %1285 }
 0x306   : > { %v1294_v28 = vsel %vm393_vm3, %v3703_v26, %v1286_v6  ;;  %1318 = vst.msk [vmem:[#allocation4 + $0x358] sm:$0xff] %vm668_vm15, %v1286_v6  ;;  %v1264_v18 = vpop.permute.xlu1 %1263  ;;  %1682 = vmatpush.msra.mxu2 %v1417_v25  ;;  %v1378_v26 = vld [vmem:[#allocation4 + $0x178] sm:$0xff]  ;;  %v1381_v33 = vld [vmem:[#allocation4 + $0x190] sm:$0xff] }
 0x307   : > { %v1287_v43 = vsel %vm393_vm3, %v1264_v18, %v3747_v27  ;;  %1582 = vmatmul.f32.gmra.mxu2 %v3698_v52  ;;  %1633 = vmatpush.msra.mxu0 %v1294_v28  ;;  %v4644_v6 = vld [vmem:[#allocation7_spill] sm:$0xff] }
 0x308   : > { %1683 = vmatpush.msra.mxu2 %v1414_v56  ;;  %1549 = vmatpush.msrb.mxu1 %v1287_v43 }
 0x309   : > { %2891 = vmatmul.msk.f32.vlgmr.msrb.gmra.mxu1 %vm1463_vm10, %v3822_v32  ;;  %1611 = vmatmul.f32.gmra.mxu3 %v3713_v38 }
 0x30a   : > { %1650 = vmatpush.msra.mxu1 %v1378_v26  ;;  %1684 = vmatpush.msra.mxu2 %v1411_v1 }
 0x30c   : > { %1651 = vmatpush.msra.mxu1 %v1375_v7  ;;  %1685 = vmatpush.msra.mxu2 %v1408_v57 }
 0x30d   : > { %v1268_v16 = vpop.permute.xlu0 %1267  ;;  %v1438_v34 = vld [vmem:[#allocation4 + $0x358] sm:$0xff] }
 0x30e   : > { %1309 = vst.msk [vmem:[#allocation4 + $0x310] sm:$0xff] %vm668_vm15, %v1268_v16  ;;  %v1280_v45 = vpop.permute.xlu1 %1279  ;;  %1720 = vmatpush.msra.mxu3 %v1438_v34  ;;  %1652 = vmatpush.msra.mxu1 %v1372_v8  ;;  %v1288_v23 = vsel %vm393_vm3, %v3747_v27, %v1268_v16  ;;  %v1357_v27 = vld [vmem:[#allocation4 + $0xd0] sm:$0xff] }
 0x30f   : > { %v1292_v54 = vsel %vm393_vm3, %v3745_v41, %v1280_v45  ;;  %1315 = vst.msk [vmem:[#allocation4 + $0x340] sm:$0xff] %vm668_vm15, %v1280_v45  ;;  %1686 = vmatpush.msra.mxu2 %v1405_v60  ;;  %v1290_v41 = vsel %vm393_vm3, %v3806_v22, %v3787_v30  ;;  %v1330_v30 = vld [vmem:[%s4595_s3 + $0x58] sm:$0xff] }
 0x310   : > { %1585 = vmatmul.f32.gmra.mxu2 %v3737_v2  ;;  %1653 = vmatpush.msra.mxu1 %v1369_v47 }
 0x311   : > { %1687 = vmatpush.msra.mxu2 %v1402_v53  ;;  %1634 = vmatpush.msra.mxu0 %v1292_v54 }
 0x312   : > { %2892 = vmatmul.msk.f32.gmra.mxu1 %vm1463_vm10, %v3837_v0  ;;  %1614 = vmatmul.f32.gmra.mxu3 %v3755_v21 }
 0x313   : > { %1654 = vmatpush.msra.mxu1 %v1366_v50  ;;  %1688 = vmatpush.msra.mxu2 %v1399_v40  ;;  %v4645_v40 = vld [vmem:[#allocation8_spill] sm:$0xff] }
 0x314   : > { %1635 = vmatpush.msra.mxu0 %v1290_v41 }
 0x315   : > { %1655 = vmatpush.msra.mxu1 %v1363_v36  ;;  %1689 = vmatpush.msra.mxu2 %v1396_v11  ;;  %v1429_v51 = vld [vmem:[#allocation4 + $0x310] sm:$0xff]  ;;  %v3887_v1 = vpop.permute.xlu0 %1455  ;;  %v1461_v11 = vpop.permute.xlu2 %1460 }
 0x316   : > { %v1435_v14 = vld [vmem:[#allocation4 + $0x340] sm:$0xff]  ;;  %1636 = vmatpush.msra.mxu0 %v1288_v23  ;;  %v3878_v12 = vpop.permute.xlu1 %1445 }
 0x317   : > { %1721 = vmatpush.msra.mxu3 %v1435_v14  ;;  %2895 = vmatmul.msk.f32.vlgmr.msra.gmra.mxu0 %vm1463_vm10, %v3822_v32 }
 0x318   : > { %1656 = vmatpush.msra.mxu1 %v1360_v29  ;;  %1690 = vmatpush.msra.mxu2 %v1393_v58 }
 0x319   : > { %1722 = vmatpush.msra.mxu3 %v1432_v49  ;;  %1588 = vmatmul.f32.gmra.mxu2 %v3779_v59 }
 0x31a   : > { %1657 = vmatpush.msra.mxu1 %v1357_v27  ;;  %1691 = vmatpush.msra.mxu2 %v1390_v55 }
 0x31b   : > { %1723 = vmatpush.msra.mxu3 %v1429_v51  ;;  %2893 = vmatmul.msk.f32.gmra.mxu1 %vm1463_vm10, %v1327_v3 }
 0x31c   : > { %1617 = vmatmul.f32.gmra.mxu3 %v3795_v19  ;;  %1658 = vmatpush.msra.mxu1 %v1354_v62 }
 0x31d   : > { %1692 = vmatpush.msra.mxu2 %v1387_v4 }
 0x31e   : > { %1659 = vmatpush.msra.mxu1 %v1351_v63  ;;  %v3881_v46 = vpop.permute.xlu1 %1450 }
 0x31f   : > { %1693 = vmatpush.msra.mxu2 %v1384_v24  ;;  %2896 = vmatmul.msk.f32.gmra.mxu0 %vm1463_vm10, %v3837_v0 }
 0x320   : > { %1660 = vmatpush.msra.mxu1 %v1348_v37 }
 0x321   : > { %1694 = vmatpush.msra.mxu2 %v1381_v33 }
 0x322   : > { %1661 = vmatpush.msra.mxu1 %v1345_v44  ;;  %1695 = vmatmul.f32.vlgmr.msra.gmra.mxu2 %v3677_v35 }
 0x323   : > { %2894 = vmatmul.msk.f32.gmra.mxu1 %vm1463_vm10, %v1330_v30 }
 0x324   : > { %1662 = vmatpush.msra.mxu1 %v1342_v17  ;;  %2899 = vmatmul.msk.f32.vlgmr.msra.gmra.mxu3 %vm1463_vm10, %v3822_v32 }
 0x326   : > { %1663 = vmatpush.msra.mxu1 %v1339_v13 }
 0x327   : > { %2897 = vmatmul.msk.f32.gmra.mxu0 %vm1463_vm10, %v1327_v3 }
 0x328   : > { %1664 = vmatpush.msra.mxu1 %v1336_v31 }
 0x32a   : > { %1665 = vmatpush.msra.mxu1 %v1333_v15  ;;  %1698 = vmatmul.f32.gmra.mxu2 %v3713_v38 }
 0x32b   : > { %1666 = vmatmul.f32.vlgmr.msra.gmra.mxu1 %v3670_v61 }
 0x32c   : > { %2900 = vmatmul.msk.f32.gmra.mxu3 %vm1463_vm10, %v3837_v0 }
 0x32f   : > { %2898 = vmatmul.msk.f32.gmra.mxu0 %vm1463_vm10, %v1330_v30 }
 0x332   : > { %1701 = vmatmul.f32.gmra.mxu2 %v3755_v21 }
 0x333   : > { %1669 = vmatmul.f32.gmra.mxu1 %v3698_v52 }
 0x334   : > { %2901 = vmatmul.msk.f32.gmra.mxu3 %vm1463_vm10, %v1327_v3 }
 0x33a   : > { %1704 = vmatmul.f32.gmra.mxu2 %v3795_v19 }
 0x33b   : > { %1672 = vmatmul.f32.gmra.mxu1 %v3737_v2 }
 0x33c   : > { %2902 = vmatmul.msk.f32.gmra.mxu3 %vm1463_vm10, %v1330_v30 }
 0x343   : > { %1675 = vmatmul.f32.gmra.mxu1 %v3779_v59 }
 0x35c   : > { %v1522_v38 = vpop.f32.mrf.mxu0 }
 0x361   : > { %v1493_v61 = vpop.f32.mrf.mxu3 }
 0x362   : > { %v1494_v52 = vadd.f32 %v1493_v61, %v3878_v12 }
 0x364   : > { %v1523_v19 = vadd.f32 %v1522_v38, %v1494_v52 }
 0x366   : > { %v1525_v48 = vpop.f32.mrf.mxu0 }
 0x36a   : > { %v1496_v35 = vpop.f32.mrf.mxu3 }
 0x36b   : > { %v1497_v59 = vadd.f32 %v1496_v35, %v3881_v46 }
 0x36d   : > { %v1526_v32 = vadd.f32 %v1525_v48, %v1497_v59 }
 0x36e   : > { %v1528_v21 = vpop.f32.mrf.mxu0 }
 0x372   : > { %v1499_v20 = vpop.f32.mrf.mxu3 }
 0x373   : > { %v1500_v57 = vadd.f32 %v1499_v20, %v3887_v1 }
 0x375   : > { %v1529_v47 = vadd.f32 %v1528_v21, %v1500_v57 }
 0x376   : > { %v1531_v28 = vpop.f32.mrf.mxu0 }
 0x37a   : > { %v1502_v22 = vpop.f32.mrf.mxu3 }
 0x37b   : > { %v1503_v23 = vadd.f32 %v1502_v22, %v1461_v11 }
 0x37d   : > { %v1532_v55 = vadd.f32 %v1531_v28, %v1503_v23 }
 0x382   : > { %v1580_v10 = vpop.f32.mrf.mxu2 }
 0x383   : > { %v1581_v43 = vadd.f32 %v1580_v10, %v3878_v12 }
 0x384   : > { %v1609_v9 = vpop.f32.mrf.mxu3 }
 0x385   : > { %v1610_v16 = vadd.f32 %v1609_v9, %v1581_v43 }
 0x386   : > { %v1551_v5 = vpop.f32.mrf.mxu1 }
 0x387   : > { %v1552_v2 = vadd.f32 %v1551_v5, %v1523_v19 }
 0x389   : > { %v1745_v39 = vmax.f32 %v1552_v2, 0.0 }
 0x38a   : > { %v1583_v42 = vpop.f32.mrf.mxu2 }
 0x38b   : > { %v1757_v25 = vmul.f32 %v1745_v39, %v4644_v6  ;;  %v1584_v0 = vadd.f32 %v1583_v42, %v3881_v46 }
 0x38c   : > { %v1612_v18 = vpop.f32.mrf.mxu3 }
 0x38d   : > { %1781 = vrot.lane.b32.xlu2 %v1757_v25, %s2954_s26  ;;  %v1613_v14 = vadd.f32 %v1612_v18, %v1584_v0 }
 0x38f   : > { %v1554_v56 = vpop.f32.mrf.mxu1 }
 0x390   : > { %v1555_v26 = vadd.f32 %v1554_v56, %v1526_v32 }
 0x392   : > { %v1748_v7 = vmax.f32 %v1555_v26, 0.0 }
 0x393   : > { %v1586_v34 = vpop.f32.mrf.mxu2 }
 0x394   : > { %v1760_v8 = vmul.f32 %v1748_v7, %v4644_v6  ;;  %v1638_v45 = vpop.f32.mrf.mxu0  ;;  %v1587_v51 = vadd.f32 %v1586_v34, %v3887_v1 }
 0x395   : > { %v1639_v60 = vadd.f32 %v1638_v45, %v1610_v16  ;;  %v1615_v54 = vpop.f32.mrf.mxu3 }
 0x396   : > { %1787 = vrot.lane.b32.xlu2 %v1760_v8, %s2954_s26  ;;  %v1616_v33 = vadd.f32 %v1615_v54, %v1587_v51 }
 0x397   : > { %v1746_v53 = vmax.f32 %v1639_v60, 0.0 }
 0x398   : > { %v1557_v50 = vpop.f32.mrf.mxu1 }
 0x399   : > { %v1758_v41 = vmul.f32 %v1746_v53, %v4645_v40  ;;  %v1558_v36 = vadd.f32 %v1557_v50, %v1529_v47 }
 0x39b   : > { %v1751_v29 = vmax.f32 %v1558_v36, 0.0  ;;  %1783 = vrot.lane.b32.xlu0 %v1758_v41, %s2954_s26 }
 0x39c   : > { %v1641_v58 = vpop.f32.mrf.mxu0  ;;  %v1589_v3 = vpop.f32.mrf.mxu2 }
 0x39d   : > { %v1763_v49 = vmul.f32 %v1751_v29, %v4644_v6  ;;  %v1642_v27 = vadd.f32 %v1641_v58, %v1613_v14  ;;  %v1590_v15 = vadd.f32 %v1589_v3, %v1461_v11 }
 0x39f   : > { %v1749_v62 = vmax.f32 %v1642_v27, 0.0  ;;  %v1618_v4 = vpop.f32.mrf.mxu3  ;;  %1793 = vrot.lane.b32.xlu2 %v1763_v49, %s2954_s26 }
 0x3a0   : > { %v1560_v63 = vpop.f32.mrf.mxu1  ;;  %v1619_v22 = vadd.f32 %v1618_v4, %v1590_v15 }
 0x3a1   : > { %v1761_v24 = vmul.f32 %v1749_v62, %v4645_v40  ;;  %v1561_v37 = vadd.f32 %v1560_v63, %v1532_v55 }
 0x3a3   : > { %v1754_v30 = vmax.f32 %v1561_v37, 0.0  ;;  %1789 = vrot.lane.b32.xlu0 %v1761_v24, %s2954_s26 }
 0x3a4   : > { %v1644_v44 = vpop.f32.mrf.mxu0 }
 0x3a5   : > { %v1766_v17 = vmul.f32 %v1754_v30, %v4644_v6  ;;  %v1645_v13 = vadd.f32 %v1644_v44, %v1616_v33  ;;  %v1696_v31 = vpop.f32.mrf.mxu2  ;;  %v4646_v6 = vld [vmem:[#allocation9_spill] sm:$0xff] }
 0x3a7   : > { %v1752_v61 = vmax.f32 %v1645_v13, 0.0  ;;  %1799 = vrot.lane.b32.xlu2 %v1766_v17, %s2954_s26  ;;  %v1725_v35 = vpop.f32.mrf.mxu3 }
 0x3a8   : > { %v1667_v38 = vpop.f32.mrf.mxu1 }
 0x3a9   : > { %v1764_v20 = vmul.f32 %v1752_v61, %v4645_v40  ;;  %v1668_v48 = vadd.f32 %v1667_v38, %v3878_v12 }
 0x3ab   : > { %v1697_v52 = vadd.f32 %v1696_v31, %v1668_v48  ;;  %1795 = vrot.lane.b32.xlu0 %v1764_v20, %s2954_s26 }
 0x3ac   : > { %v1647_v21 = vpop.f32.mrf.mxu0 }
 0x3ad   : > { %v1648_v10 = vadd.f32 %v1647_v21, %v1619_v22  ;;  %v1726_v9 = vadd.f32 %v1725_v35, %v1697_v52  ;;  %v1699_v19 = vpop.f32.mrf.mxu2 }
 0x3af   : > { %v1755_v5 = vmax.f32 %v1648_v10, 0.0  ;;  %v1747_v2 = vmax.f32 %v1726_v9, 0.0  ;;  %v1728_v39 = vpop.f32.mrf.mxu3 }
 0x3b0   : > { %v1670_v59 = vpop.f32.mrf.mxu1 }
 0x3b1   : > { %v1767_v42 = vmul.f32 %v1755_v5, %v4645_v40  ;;  %v1759_v25 = vmul.f32 %v1747_v2, %v4646_v6  ;;  %v1671_v28 = vadd.f32 %v1670_v59, %v3881_v46 }
 0x3b3   : > { %v1700_v18 = vadd.f32 %v1699_v19, %v1671_v28  ;;  %1785 = vrot.lane.b32.xlu1 %v1759_v25, %s2954_s26  ;;  %1801 = vrot.lane.b32.xlu0 %v1767_v42, %s2954_s26 }
 0x3b5   : > { %v1729_v12 = vadd.f32 %v1728_v39, %v1700_v18  ;;  %v1702_v32 = vpop.f32.mrf.mxu2 }
 0x3b7   : > { %v1750_v43 = vmax.f32 %v1729_v12, 0.0  ;;  %v1731_v26 = vpop.f32.mrf.mxu3 }
 0x3b8   : > { %v1673_v56 = vpop.f32.mrf.mxu1 }
 0x3b9   : > { %v1762_v7 = vmul.f32 %v1750_v43, %v4646_v6  ;;  %v1674_v57 = vadd.f32 %v1673_v56, %v3887_v1 }
 0x3bb   : > { %v1703_v16 = vadd.f32 %v1702_v32, %v1674_v57  ;;  %1791 = vrot.lane.b32.xlu1 %v1762_v7, %s2954_s26 }
 0x3bd   : > { %v1732_v34 = vadd.f32 %v1731_v26, %v1703_v16  ;;  %v1705_v45 = vpop.f32.mrf.mxu2 }
 0x3bf   : > { %v1753_v8 = vmax.f32 %v1732_v34, 0.0  ;;  %v1734_v47 = vpop.f32.mrf.mxu3 }
 0x3c0   : > { %v1676_v46 = vpop.f32.mrf.mxu1 }
 0x3c1   : > { %v1765_v60 = vmul.f32 %v1753_v8, %v4646_v6  ;;  %v1677_v54 = vadd.f32 %v1676_v46, %v1461_v11 }
 0x3c3   : > { %v1706_v0 = vadd.f32 %v1705_v45, %v1677_v54  ;;  %1797 = vrot.lane.b32.xlu1 %v1765_v60, %s2954_s26 }
 0x3c5   : > { %v1735_v53 = vadd.f32 %v1734_v47, %v1706_v0 }
 0x3c7   : > { %v1756_v50 = vmax.f32 %v1735_v53, 0.0 }
 0x3c9   : > { %v1768_v40 = vmul.f32 %v1756_v50, %v4646_v6 }
 0x3cb   : > { %1803 = vrot.lane.b32.xlu1 %v1768_v40, %s2954_s26 }
 0x3e7   : > { %v1782_v1 = vpop.permute.xlu2 %1781 }
 0x3e8   : > { %1825 = vst.msk [vmem:[#allocation3] sm:$0xff] %vm640_vm13, %v1782_v1 }
 0x3ef   : > { %v3918_v41 = vld [vmem:[#allocation3] sm:$0xff] }
 0x3f0   : > { %1849 = vst [vmem:[#allocation4] sm:$0xff] %v3918_v41  ;;  %v1788_v36 = vpop.permute.xlu2 %1787  ;;  %2285 = vrot.lane.b32.xlu1 %v3918_v41, %s2952_s19  ;;  %2045 = vrot.lane.b32.xlu0 %v3918_v41, %s2948_s15 }
 0x3f1   : > { %1828 = vst.msk [vmem:[#allocation3 + $0x18] sm:$0xff] %vm640_vm13, %v1788_v36  ;;  %1885 = vrot.lane.b32.xlu2 %v3918_v41, %s2949_s16 }
 0x3f8   : > { %v3928_v11 = vld [vmem:[#allocation3 + $0x18] sm:$0xff]  ;;  %2205 = vrot.lane.b32.xlu1 %v3918_v41, %s2950_s17  ;;  %2125 = vrot.lane.b32.xlu0 %v3918_v41, %s2947_s14 }
 0x3f9   : > { %1852 = vst [vmem:[#allocation4 + $0x18] sm:$0xff] %v3928_v11  ;;  %v1794_v23 = vpop.permute.xlu2 %1793  ;;  %1965 = vrot.lane.b32.xlu2 %v3918_v41, %s2946_s13 }
 0x3fa   : > { %1831 = vst.msk [vmem:[#allocation3 + $0x30] sm:$0xff] %vm640_vm13, %v1794_v23 }
 0x400   : > { %2445 = vrot.lane.b32.xlu0 %v3918_v41, %s2945_s12  ;;  %2051 = vrot.lane.b32.xlu1 %v3928_v11, %s2948_s15 }
 0x401   : > { %v3942_v14 = vld [vmem:[#allocation3 + $0x30] sm:$0xff]  ;;  %v1800_v29 = vpop.permute.xlu2 %1799  ;;  %2365 = vrot.lane.b32.xlu2 %v3918_v41, %s2951_s18 }
 0x402   : > { %1834 = vst.msk [vmem:[#allocation3 + $0x48] sm:$0xff] %vm640_vm13, %v1800_v29 }
 0x408   : > { %2371 = vrot.lane.b32.xlu0 %v3928_v11, %s2951_s18  ;;  %2131 = vrot.lane.b32.xlu1 %v3928_v11, %s2947_s14 }
 0x409   : > { %1891 = vrot.lane.b32.xlu2 %v3928_v11, %s2949_s16  ;;  %v3953_v58 = vld [vmem:[#allocation3 + $0x48] sm:$0xff] }
 0x40d   : > { %v1784_v49 = vpop.permute.xlu0 %1783 }
 0x40e   : > { %v3956_v3 = vsel %vm543_vm11, %v1782_v1, %v1784_v49 }
 0x40f   : > { %1850 = vst [vmem:[#allocation4 + $0x8] sm:$0xff] %v3956_v3 }
 0x410   : > { %2211 = vrot.lane.b32.xlu0 %v3928_v11, %s2950_s17  ;;  %2377 = vrot.lane.b32.xlu1 %v3942_v14, %s2951_s18 }
 0x411   : > { %2291 = vrot.lane.b32.xlu2 %v3928_v11, %s2952_s19 }
 0x415   : > { %v1790_v27 = vpop.permute.xlu0 %1789 }
 0x416   : > { %v3966_v55 = vsel %vm543_vm11, %v1788_v36, %v1790_v27 }
 0x417   : > { %1853 = vst [vmem:[#allocation4 + $0x20] sm:$0xff] %v3966_v55 }
 0x418   : > { %2451 = vrot.lane.b32.xlu0 %v3928_v11, %s2945_s12  ;;  %2303 = vrot.lane.b32.xlu1 %v3953_v58, %s2952_s19 }
 0x419   : > { %1971 = vrot.lane.b32.xlu2 %v3928_v11, %s2946_s13 }
 0x41d   : > { %v1796_v51 = vpop.permute.xlu0 %1795 }
 0x41e   : > { %v3976_v62 = vsel %vm543_vm11, %v1794_v23, %v1796_v51 }
 0x41f   : > { %1856 = vst [vmem:[#allocation4 + $0x38] sm:$0xff] %v3976_v62 }
 0x420   : > { %2297 = vrot.lane.b32.xlu0 %v3942_v14, %s2952_s19  ;;  %2127 = vrot.lane.b32.xlu1 %v3956_v3, %s2947_s14 }
 0x421   : > { %1897 = vrot.lane.b32.xlu2 %v3942_v14, %s2949_s16 }
 0x425   : > { %v1802_v4 = vpop.permute.xlu0 %1801  ;;  %v1786_v63 = vpop.permute.xlu1 %1785 }
 0x426   : > { %v3986_v24 = vsel %vm543_vm11, %v1800_v29, %v1802_v4  ;;  %v1806_v37 = vsel %vm543_vm11, %v1784_v49, %v1786_v63 }
 0x427   : > { %1859 = vst [vmem:[#allocation4 + $0x50] sm:$0xff] %v3986_v24 }
 0x428   : > { %1977 = vrot.lane.b32.xlu0 %v3942_v14, %s2946_s13  ;;  %2447 = vrot.lane.b32.xlu1 %v3956_v3, %s2945_s12  ;;  %1827 = vst.msk [vmem:[#allocation3 + $0x10] sm:$0xff] %vm643_vm14, %v1806_v37 }
 0x429   : > { %2217 = vrot.lane.b32.xlu2 %v3942_v14, %s2950_s17 }
 0x42d   : > { %v1792_v33 = vpop.permute.xlu1 %1791 }
 0x42e   : > { %v1808_v30 = vsel %vm543_vm11, %v1790_v27, %v1792_v33 }
 0x42f   : > { %1830 = vst.msk [vmem:[#allocation3 + $0x28] sm:$0xff] %vm643_vm14, %v1808_v30  ;;  %v3999_v44 = vld [vmem:[#allocation3 + $0x10] sm:$0xff] }
 0x430   : > { %2457 = vrot.lane.b32.xlu0 %v3942_v14, %s2945_s12  ;;  %2373 = vrot.lane.b32.xlu1 %v3966_v55, %s2951_s18  ;;  %1851 = vst.msk [vmem:[#allocation4 + $0x10] sm:$0xff] %vm668_vm15, %v3999_v44 }
 0x431   : > { %2057 = vrot.lane.b32.xlu2 %v3942_v14, %s2948_s15 }
 0x435   : > { %v1798_v17 = vpop.permute.xlu1 %1797 }
 0x436   : > { %v4009_v13 = vld [vmem:[#allocation3 + $0x28] sm:$0xff]  ;;  %v1810_v31 = vsel %vm543_vm11, %v1796_v51, %v1798_v17 }
 0x437   : > { %1854 = vst.msk [vmem:[#allocation4 + $0x28] sm:$0xff] %vm668_vm15, %v4009_v13 }
 0x438   : > { %1833 = vst.msk [vmem:[#allocation3 + $0x40] sm:$0xff] %vm643_vm14, %v1810_v31  ;;  %2213 = vrot.lane.b32.xlu1 %v3966_v55, %s2950_s17  ;;  %2223 = vrot.lane.b32.xlu0 %v3953_v58, %s2950_s17 }
 0x439   : > { %2137 = vrot.lane.b32.xlu2 %v3942_v14, %s2947_s14 }
 0x43d   : > { %v1804_v15 = vpop.permute.xlu1 %1803 }
 0x43e   : > { %v1812_v61 = vsel %vm543_vm11, %v1802_v4, %v1804_v15 }
 0x43f   : > { %v4022_v35 = vld [vmem:[#allocation3 + $0x40] sm:$0xff]  ;;  %1836 = vst.msk [vmem:[#allocation3 + $0x58] sm:$0xff] %vm643_vm14, %v1812_v61 }
 0x440   : > { %1857 = vst.msk [vmem:[#allocation4 + $0x40] sm:$0xff] %vm668_vm15, %v4022_v35  ;;  %2053 = vrot.lane.b32.xlu1 %v3966_v55, %s2948_s15  ;;  %2063 = vrot.lane.b32.xlu0 %v3953_v58, %s2948_s15 }
 0x441   : > { %1903 = vrot.lane.b32.xlu2 %v3953_v58, %s2949_s16 }
 0x446   : > { %v4033_v38 = vld [vmem:[#allocation3 + $0x58] sm:$0xff] }
 0x447   : > { %1860 = vst.msk [vmem:[#allocation4 + $0x58] sm:$0xff] %vm668_vm15, %v4033_v38 }
 0x448   : > { %1973 = vrot.lane.b32.xlu1 %v3966_v55, %s2946_s13  ;;  %2143 = vrot.lane.b32.xlu0 %v3953_v58, %s2947_s14 }
 0x449   : > { %2383 = vrot.lane.b32.xlu2 %v3953_v58, %s2951_s18 }
 0x44b   : > { %v4043_v20 = vpop.permute.xlu2 %1885 }
 0x450   : > { %2453 = vrot.lane.b32.xlu1 %v3966_v55, %s2945_s12  ;;  %2463 = vrot.lane.b32.xlu0 %v3953_v58, %s2945_s12 }
 0x451   : > { %1983 = vrot.lane.b32.xlu2 %v3953_v58, %s2946_s13 }
 0x453   : > { %v4051_v48 = vpop.permute.xlu2 %1965 }
 0x458   : > { %2299 = vrot.lane.b32.xlu1 %v3976_v62, %s2952_s19  ;;  %1887 = vrot.lane.b32.xlu0 %v3956_v3, %s2949_s16 }
 0x459   : > { %2287 = vrot.lane.b32.xlu2 %v3956_v3, %s2952_s19 }
 0x45b   : > { %v4059_v22 = vpop.permute.xlu2 %2365 }
 0x460   : > { %1979 = vrot.lane.b32.xlu1 %v3976_v62, %s2946_s13  ;;  %1967 = vrot.lane.b32.xlu0 %v3956_v3, %s2946_s13 }
 0x461   : > { %2207 = vrot.lane.b32.xlu2 %v3956_v3, %s2950_s17 }
 0x462   : > { %v4067_v52 = vpop.permute.xlu0 %2045  ;;  %v4069_v21 = vpop.permute.xlu1 %2285 }
 0x463   : > { %v4071_v10 = vpop.permute.xlu2 %1891 }
 0x468   : > { %2459 = vrot.lane.b32.xlu1 %v3976_v62, %s2945_s12  ;;  %2367 = vrot.lane.b32.xlu0 %v3956_v3, %s2951_s18 }
 0x469   : > { %2133 = vrot.lane.b32.xlu2 %v3966_v55, %s2947_s14 }
 0x46a   : > { %v2126_v9 = vpop.permute.xlu0 %2125  ;;  %v4079_v19 = vpop.permute.xlu1 %2205 }
 0x46b   : > { %v4081_v5 = vpop.permute.xlu2 %2291 }
 0x470   : > { %2047 = vrot.lane.b32.xlu0 %v3956_v3, %s2948_s15  ;;  %2225 = vrot.lane.b32.xlu1 %v3986_v24, %s2950_s17 }
 0x471   : > { %2379 = vrot.lane.b32.xlu2 %v3976_v62, %s2951_s18 }
 0x472   : > { %v2446_v2 = vpop.permute.xlu0 %2445  ;;  %v2052_v39 = vpop.permute.xlu1 %2051 }
 0x473   : > { %v1972_v59 = vpop.permute.xlu2 %1971 }
 0x478   : > { %1893 = vrot.lane.b32.xlu0 %v3966_v55, %s2949_s16  ;;  %2065 = vrot.lane.b32.xlu1 %v3986_v24, %s2948_s15 }
 0x479   : > { %2059 = vrot.lane.b32.xlu2 %v3976_v62, %s2948_s15 }
 0x47a   : > { %v2372_v42 = vpop.permute.xlu0 %2371  ;;  %v4095_v6 = vpop.permute.xlu1 %2131 }
 0x47b   : > { %v4097_v25 = vpop.permute.xlu2 %1897 }
 0x480   : > { %2293 = vrot.lane.b32.xlu0 %v3966_v55, %s2952_s19  ;;  %2145 = vrot.lane.b32.xlu1 %v3986_v24, %s2947_s14 }
 0x481   : > { %2305 = vrot.lane.b32.xlu2 %v3986_v24, %s2952_s19 }
 0x482   : > { %v2212_v28 = vpop.permute.xlu0 %2211  ;;  %v4105_v18 = vpop.permute.xlu1 %2377 }
 0x483   : > { %v4107_v12 = vpop.permute.xlu2 %2217 }
 0x488   : > { %1899 = vrot.lane.b32.xlu0 %v3976_v62, %s2949_s16  ;;  %2465 = vrot.lane.b32.xlu1 %v3986_v24, %s2945_s12 }
 0x489   : > { %1985 = vrot.lane.b32.xlu2 %v3986_v24, %s2946_s13 }
 0x48a   : > { %v2452_v32 = vpop.permute.xlu0 %2451  ;;  %v4115_v43 = vpop.permute.xlu1 %2303 }
 0x48b   : > { %v4117_v56 = vpop.permute.xlu2 %2057 }
 0x490   : > { %2219 = vrot.lane.b32.xlu0 %v3976_v62, %s2950_s17  ;;  %1889 = vrot.lane.b32.xlu1 %v3999_v44, %s2949_s16 }
 0x491   : > { %2289 = vrot.lane.b32.xlu2 %v3999_v44, %s2952_s19 }
 0x492   : > { %v2298_v26 = vpop.permute.xlu0 %2297  ;;  %v4125_v7 = vpop.permute.xlu1 %2127 }
 0x493   : > { %4647 = vst [vmem:[#allocation13_spill] sm:$0xff] %v4125_v7  ;;  %v4127_v57 = vpop.permute.xlu2 %2137  ;;  %v4131_v16 = vsel %vm349_vm0, %v2126_v9, %v4125_v7 }
 0x498   : > { %2139 = vrot.lane.b32.xlu0 %v3976_v62, %s2947_s14  ;;  %1969 = vrot.lane.b32.xlu1 %v3999_v44, %s2946_s13 }
 0x499   : > { %2055 = vrot.lane.b32.xlu2 %v4009_v13, %s2948_s15 }
 0x49a   : > { %v1978_v34 = vpop.permute.xlu0 %1977  ;;  %v4139_v8 = vpop.permute.xlu1 %2447 }
 0x49b   : > { %4648 = vst [vmem:[#allocation15_spill] sm:$0xff] %v4139_v8  ;;  %v4141_v46 = vpop.permute.xlu2 %1903  ;;  %v4145_v45 = vsel %vm393_vm3, %v2446_v2, %v4139_v8 }
 0x4a0   : > { %1905 = vrot.lane.b32.xlu0 %v3986_v24, %s2949_s16  ;;  %2049 = vrot.lane.b32.xlu1 %v3999_v44, %s2948_s15 }
 0x4a1   : > { %1975 = vrot.lane.b32.xlu2 %v4009_v13, %s2946_s13 }
 0x4a2   : > { %v2458_v60 = vpop.permute.xlu0 %2457  ;;  %v4153_v54 = vpop.permute.xlu1 %2373 }
 0x4a3   : > { %v4155_v47 = vpop.permute.xlu2 %2383  ;;  %v4159_v0 = vsel %vm382_vm8, %v2372_v42, %v4153_v54 }
 0x4a8   : > { %2385 = vrot.lane.b32.xlu0 %v3986_v24, %s2951_s18  ;;  %2369 = vrot.lane.b32.xlu1 %v3999_v44, %s2951_s18 }
 0x4a9   : > { %2295 = vrot.lane.b32.xlu2 %v4009_v13, %s2952_s19 }
 0x4aa   : > { %v4167_v53 = vpop.permute.xlu0 %2223  ;;  %v4169_v50 = vpop.permute.xlu1 %2213 }
 0x4ab   : > { %v1984_v40 = vpop.permute.xlu2 %1983  ;;  %v4173_v1 = vsel %vm360_vm2, %v2212_v28, %v4169_v50 }
 0x4b0   : > { %2375 = vrot.lane.b32.xlu0 %v4009_v13, %s2951_s18  ;;  %1895 = vrot.lane.b32.xlu1 %v4009_v13, %s2949_s16 }
 0x4b1   : > { %1981 = vrot.lane.b32.xlu2 %v4022_v35, %s2946_s13 }
 0x4b2   : > { %v4181_v36 = vpop.permute.xlu0 %2063  ;;  %v4183_v23 = vpop.permute.xlu1 %2053 }
 0x4b3   : > { %v4185_v29 = vpop.permute.xlu2 %2287  ;;  %v4189_v49 = vsel %vm338_vm5, %v2052_v39, %v4183_v23 }
 0x4b4   : > { %v4194_v3 = vsel %vm371_vm9, %v4069_v21, %v4185_v29 }
 0x4b8   : > { %2061 = vrot.lane.b32.xlu0 %v4022_v35, %s2948_s15  ;;  %1901 = vrot.lane.b32.xlu1 %v4022_v35, %s2949_s16 }
 0x4b9   : > { %2301 = vrot.lane.b32.xlu2 %v4022_v35, %s2952_s19 }
 0x4ba   : > { %v4202_v27 = vpop.permute.xlu0 %2143  ;;  %v4204_v55 = vpop.permute.xlu1 %1973 }
 0x4bb   : > { %v4206_v51 = vpop.permute.xlu2 %2207  ;;  %v4210_v62 = vsel %vm327_vm4, %v1972_v59, %v4204_v55 }
 0x4bc   : > { %v4215_v4 = vsel %vm360_vm2, %v4079_v19, %v4206_v51 }
 0x4c0   : > { %2381 = vrot.lane.b32.xlu1 %v4022_v35, %s2951_s18  ;;  %1987 = vrot.lane.b32.xlu0 %v4033_v38, %s2946_s13 }
 0x4c1   : > { %2067 = vrot.lane.b32.xlu2 %v4033_v38, %s2948_s15 }
 0x4c2   : > { %v4223_v63 = vpop.permute.xlu0 %2463  ;;  %v4225_v24 = vpop.permute.xlu1 %2453 }
 0x4c3   : > { %v4227_v37 = vpop.permute.xlu2 %2133  ;;  %v4231_v33 = vsel %vm393_vm3, %v2452_v32, %v4225_v24 }
 0x4c4   : > { %4649 = vst [vmem:[#allocation10_spill] sm:$0xff] %v4227_v37  ;;  %v4236_v30 = vsel %vm349_vm0, %v4095_v6, %v4227_v37 }
 0x4c8   : > { %2387 = vrot.lane.b32.xlu0 %v4033_v38, %s2951_s18  ;;  %1907 = vrot.lane.b32.xlu1 %v4033_v38, %s2949_s16  ;;  %s302_s16 = scalar_lea.vmem %s4600_s8, %s2908_s6 }
 0x4c9   : > { %2461 = vrot.lane.b32.xlu2 %v4022_v35, %s2945_s12 }
 0x4ca   : > { %v4244_v17 = vpop.permute.xlu0 %1887  ;;  %v4246_v31 = vpop.permute.xlu1 %2299 }
 0x4cb   : > { %v4251_v15 = vsel %vm316_vm6, %v4043_v20, %v4244_v17  ;;  %v4253_v61 = vpop.permute.xlu2 %2379  ;;  %v4257_v21 = vsel %vm371_vm9, %v2298_v26, %v4246_v31 }
 0x4cc   : > { %v4262_v9 = vsel %vm382_vm8, %v4105_v18, %v4253_v61 }
 0x4d0   : > { %2215 = vrot.lane.b32.xlu0 %v4009_v13, %s2950_s17  ;;  %2221 = vrot.lane.b32.xlu1 %v4022_v35, %s2950_s17 }
 0x4d1   : > { %2307 = vrot.lane.b32.xlu2 %v4033_v38, %s2952_s19 }
 0x4d2   : > { %v4270_v20 = vpop.permute.xlu0 %1967  ;;  %v4272_v19 = vpop.permute.xlu1 %1979 }
 0x4d3   : > { %v1989_v2 = vsel %vm327_vm4, %v4051_v48, %v4270_v20  ;;  %v4277_v39 = vpop.permute.xlu2 %2059  ;;  %v1993_v59 = vsel %vm327_vm4, %v1978_v34, %v4272_v19 }
 0x4d4   : > { %v2073_v42 = vsel %vm338_vm5, %v4117_v56, %v4277_v39 }
 0x4d8   : > { %2467 = vrot.lane.b32.xlu0 %v4033_v38, %s2945_s12  ;;  %2455 = vrot.lane.b32.xlu1 %v4009_v13, %s2945_s12 }
 0x4d9   : > { %2227 = vrot.lane.b32.xlu2 %v4033_v38, %s2950_s17 }
 0x4da   : > { %v4290_v6 = vpop.permute.xlu0 %2367  ;;  %v4292_v48 = vpop.permute.xlu1 %2459 }
 0x4db   : > { %v4297_v28 = vsel %vm382_vm8, %v4059_v22, %v4290_v6  ;;  %v4299_v18 = vpop.permute.xlu2 %2305  ;;  %v2473_v32 = vsel %vm393_vm3, %v2458_v60, %v4292_v48 }
 0x4dc   : > { %v4306_v56 = vsel %vm371_vm9, %v4115_v43, %v4299_v18 }
 0x4e0   : > { %2449 = vrot.lane.b32.xlu0 %v3999_v44, %s2945_s12  ;;  %2147 = vrot.lane.b32.xlu1 %v4033_v38, %s2947_s14 }
 0x4e1   : > { %2209 = vrot.lane.b32.xlu2 %v3999_v44, %s2950_s17 }
 0x4e2   : > { %v4314_v22 = vpop.permute.xlu0 %2047  ;;  %v4316_v26 = vpop.permute.xlu1 %2225 }
 0x4e3   : > { %v2069_v34 = vsel %vm338_vm5, %v4067_v52, %v4314_v22  ;;  %v4321_v60 = vpop.permute.xlu2 %1985  ;;  %v4326_v43 = vsel %vm360_vm2, %v4167_v53, %v4316_v26 }
 0x4e4   : > { %v1995_v38 = vsel %vm327_vm4, %v1984_v40, %v4321_v60 }
 0x4e8   : > { %2135 = vrot.lane.b32.xlu0 %v4009_v13, %s2947_s14  ;;  %2129 = vrot.lane.b32.xlu1 %v3999_v44, %s2947_s14  ;;  %v2610_v44 = vld [vmem:[#allocation5] sm:$0x1] }
 0x4e9   : > { %2141 = vrot.lane.b32.xlu2 %v4022_v35, %s2947_s14 }
 0x4ea   : > { %v4336_v52 = vpop.permute.xlu0 %1893  ;;  %v4338_v7 = vpop.permute.xlu1 %2065 }
 0x4eb   : > { %v1911_v53 = vsel %vm316_vm6, %v4071_v10, %v4336_v52  ;;  %v2290_v37 = vpop.permute.xlu2 %2289  ;;  %v2075_v40 = vsel %vm338_vm5, %v4181_v36, %v4338_v7 }
 0x4ec   : > { %v4348_v13 = vsel %vm371_vm9, %v4185_v29, %v2290_v37  ;;  %2625 = vmatpush.msrb.mxu0 %v2075_v40  ;;  %2331 = vst.msk [vmem:[#allocation4 + $0x250] sm:$0xff] %vm668_vm15, %v2290_v37 }
 0x4ee   : > { %2626 = vmatpush.msrb.mxu0 %v2073_v42 }
 0x4f0   : > { %2627 = vmatpush.msrb.mxu0 %v4189_v49 }
 0x4f1   : > { %2613 = vperm.xlu2 %2928, %v2610_v44  }
 0x4f2   : > { %v2294_v35 = vpop.permute.xlu0 %2293  ;;  %v4352_v8 = vpop.permute.xlu1 %2145  ;;  %2628 = vmatpush.msrb.mxu0 %v2069_v34 }
 0x4f3   : > { %v4356_v10 = vsel %vm371_vm9, %v4081_v5, %v2294_v35  ;;  %v2056_v36 = vpop.permute.xlu2 %2055  ;;  %v4365_v37 = vsel %vm349_vm0, %v4202_v27, %v4352_v8 }
 0x4f4   : > { %v4360_v29 = vsel %vm338_vm5, %v4183_v23, %v2056_v36  ;;  %2629 = vmatpush.msrb.mxu0 %v1995_v38  ;;  %2094 = vst.msk [vmem:[#allocation4 + $0x148] sm:$0xff] %vm668_vm15, %v2056_v36  ;;  %v4435_v36 = vld [vmem:[%s4597_s5] sm:$0x7] }
 0x4f6   : > { %2630 = vmatpush.msrb.mxu0 %v1993_v59 }
 0x4f8   : > { %2631 = vmatpush.msrb.mxu0 %v4210_v62 }
 0x4fa   : > { %v4369_v49 = vpop.permute.xlu0 %1899  ;;  %v4371_v5 = vpop.permute.xlu1 %2465  ;;  %2632 = vmatpush.msrb.mxu0 %v1989_v2 }
 0x4fb   : > { %v1913_v23 = vsel %vm316_vm6, %v4097_v25, %v4369_v49  ;;  %v1976_v42 = vpop.permute.xlu2 %1975  ;;  %v2475_v27 = vsel %vm393_vm3, %v4223_v63, %v4371_v5 }
 0x4fc   : > { %v4381_v34 = vsel %vm327_vm4, %v4204_v55, %v1976_v42  ;;  %2677 = vmatpush.msrb.mxu2 %v2475_v27  ;;  %2014 = vst.msk [vmem:[#allocation4 + $0xe8] sm:$0xff] %vm668_vm15, %v1976_v42 }
 0x4fe   : > { %2678 = vmatpush.msrb.mxu2 %v2473_v32 }
 0x500   : > { %2679 = vmatpush.msrb.mxu2 %v4231_v33 }
 0x502   : > { %v4385_v62 = vpop.permute.xlu0 %2219  ;;  %v1890_v2 = vpop.permute.xlu1 %1889  ;;  %2680 = vmatpush.msrb.mxu2 %v4145_v45 }
 0x503   : > { %v4391_v25 = vsel %vm360_vm2, %v4107_v12, %v4385_v62  ;;  %v2296_v63 = vpop.permute.xlu2 %2295  ;;  %1931 = vst.msk [vmem:[#allocation4 + $0x70] sm:$0xff] %vm668_vm15, %v1890_v2  ;;  %v4399_v59 = vsel %vm316_vm6, %v4244_v17, %v1890_v2 }
 0x504   : > { %v4395_v55 = vsel %vm371_vm9, %v2294_v35, %v2296_v63  ;;  %2334 = vst.msk [vmem:[#allocation4 + $0x268] sm:$0xff] %vm668_vm15, %v2296_v63 }
 0x50a   : > { %v4402_v33 = vpop.permute.xlu0 %2139  ;;  %v1970_v45 = vpop.permute.xlu1 %1969 }
 0x50b   : > { %v4407_v12 = vsel %vm349_vm0, %v4127_v57, %v4402_v33  ;;  %v1982_v32 = vpop.permute.xlu2 %1981  ;;  %2011 = vst.msk [vmem:[#allocation4 + $0xd0] sm:$0xff] %vm668_vm15, %v1970_v45  ;;  %v4416_v17 = vsel %vm327_vm4, %v4270_v20, %v1970_v45 }
 0x50c   : > { %v4412_v38 = vsel %vm327_vm4, %v4272_v19, %v1982_v32  ;;  %2017 = vst.msk [vmem:[#allocation4 + $0x100] sm:$0xff] %vm668_vm15, %v1982_v32  ;;  %v2512_v32 = vld [vmem:[#allocation4 + $0x50] sm:$0xff] }
 0x512   : > { %v4419_v40 = vpop.permute.xlu0 %1905  ;;  %v2050_v44 = vpop.permute.xlu1 %2049 }
 0x513   : > { %v1915_v57 = vsel %vm316_vm6, %v4141_v46, %v4419_v40  ;;  %v2302_v35 = vpop.permute.xlu2 %2301  ;;  %2091 = vst.msk [vmem:[#allocation4 + $0x130] sm:$0xff] %vm668_vm15, %v2050_v44  ;;  %v2070_v20 = vsel %vm338_vm5, %v4314_v22, %v2050_v44 }
 0x514   : > { %v4427_v19 = vsel %vm371_vm9, %v4246_v31, %v2302_v35  ;;  %2633 = vmatpush.msrb.mxu0 %v1915_v57  ;;  %2337 = vst.msk [vmem:[#allocation4 + $0x280] sm:$0xff] %vm668_vm15, %v2302_v35  ;;  %v4441_v31 = vperm.slane %v4435_v36, 2 }
 0x516   : > { %2634 = vmatpush.msrb.mxu0 %v1913_v23  ;;  %2903 = vmatmul.msk.f32.vlgmr.msrb.gmra.mxu2 %vm1463_vm10, %v4441_v31 }
 0x518   : > { %2635 = vmatpush.msrb.mxu0 %v1911_v53 }
 0x51a   : > { %v4437_v46 = vpop.permute.xlu0 %2385  ;;  %v2370_v42 = vpop.permute.xlu1 %2369  ;;  %2636 = vmatpush.msrb.mxu0 %v4251_v15 }
 0x51b   : > { %v2395_v22 = vsel %vm382_vm8, %v4155_v47, %v4437_v46  ;;  %v2068_v27 = vpop.permute.xlu2 %2067  ;;  %2411 = vst.msk [vmem:[#allocation4 + $0x2b0] sm:$0xff] %vm668_vm15, %v2370_v42  ;;  %v4451_v23 = vsel %vm382_vm8, %v4290_v6, %v2370_v42  ;;  %v4460_v47 = vperm.slane %v4435_v36, 0  ;;  %v2507_v42 = vld [vmem:[#allocation4 + $0x28] sm:$0xff] }
 0x51c   : > { %v2076_v53 = vsel %vm338_vm5, %v4338_v7, %v2068_v27  ;;  %2637 = vmatpush.msrb.mxu0 %v3953_v58  ;;  %2645 = vmatpush.msrb.mxu1 %v2395_v22  ;;  %2100 = vst.msk [vmem:[#allocation4 + $0x178] sm:$0xff] %vm668_vm15, %v2068_v27  ;;  %v4650_v22 = vld [vmem:[#allocation15_spill] sm:$0xff] }
 0x51d   : > { %2685 = vmatpush.msrb.mxu3 %v2076_v53 }
 0x51e   : > { %2638 = vmatpush.msrb.mxu0 %v3942_v14  ;;  %2646 = vmatpush.msrb.mxu1 %v4262_v9 }
 0x520   : > { %2639 = vmatpush.msrb.mxu0 %v3928_v11  ;;  %2647 = vmatpush.msrb.mxu1 %v4159_v0 }
 0x522   : > { %v2376_v7 = vpop.permute.xlu0 %2375  ;;  %v1896_v58 = vpop.permute.xlu1 %1895  ;;  %2640 = vmatpush.msrb.mxu0 %v3918_v41  ;;  %2648 = vmatpush.msrb.mxu1 %v4297_v28 }
 0x523   : > { %v4468_v15 = vsel %vm382_vm8, %v4153_v54, %v2376_v7  ;;  %2414 = vst.msk [vmem:[#allocation4 + $0x2c8] sm:$0xff] %vm668_vm15, %v2376_v7  ;;  %v2462_v14 = vpop.permute.xlu2 %2461  ;;  %2641 = vmatmul.f32.vlgmr.msrb.gmra.mxu0 %v4460_v47  ;;  %v4478_v0 = vsel %vm316_vm6, %v4336_v52, %v1896_v58  ;;  %v2549_v41 = vld [vmem:[#allocation4 + $0x178] sm:$0xff]  ;;  %v2504_v7 = vld [vmem:[#allocation4 + $0x10] sm:$0xff] }
 0x524   : > { %v4474_v11 = vsel %vm393_vm3, %v4292_v48, %v2462_v14  ;;  %2649 = vmatpush.msrb.mxu1 %v4306_v56  ;;  %2497 = vst.msk [vmem:[#allocation4 + $0x340] sm:$0xff] %vm668_vm15, %v2462_v14  ;;  %2745 = vmatpush.msra.mxu2 %v2549_v41 }
 0x525   : > { %1934 = vst.msk [vmem:[#allocation4 + $0x88] sm:$0xff] %vm668_vm15, %v1896_v58 }
 0x526   : > { %2650 = vmatpush.msrb.mxu1 %v4257_v21 }
 0x528   : > { %2651 = vmatpush.msrb.mxu1 %v4356_v10  ;;  %v2543_v10 = vld [vmem:[#allocation4 + $0x148] sm:$0xff] }
 0x52a   : > { %v2062_v54 = vpop.permute.xlu0 %2061  ;;  %v1902_v9 = vpop.permute.xlu1 %1901  ;;  %2652 = vmatpush.msrb.mxu1 %v4194_v3 }
 0x52b   : > { %v2074_v6 = vsel %vm338_vm5, %v4277_v39, %v2062_v54  ;;  %2097 = vst.msk [vmem:[#allocation4 + $0x160] sm:$0xff] %vm668_vm15, %v2062_v54  ;;  %v2308_v48 = vpop.permute.xlu2 %2307  ;;  %v1914_v21 = vsel %vm316_vm6, %v4369_v49, %v1902_v9  ;;  %v4651_v54 = vld [vmem:[#allocation10_spill] sm:$0xff] }
 0x52c   : > { %v4491_v28 = vsel %vm371_vm9, %v4299_v18, %v2308_v48  ;;  %2653 = vmatpush.msrb.mxu1 %v4326_v43  ;;  %2686 = vmatpush.msrb.mxu3 %v2074_v6  ;;  %2340 = vst.msk [vmem:[#allocation4 + $0x298] sm:$0xff] %vm668_vm15, %v2308_v48  ;;  %v2519_v35 = vld [vmem:[#allocation4 + $0x88] sm:$0xff]  ;;  %v4652_v6 = vld [vmem:[#allocation13_spill] sm:$0xff]  ;;  %v2588_v48 = vld [vmem:[#allocation4 + $0x2b0] sm:$0xff] }
 0x52d   : > { %1937 = vst.msk [vmem:[#allocation4 + $0xa0] sm:$0xff] %vm668_vm15, %v1902_v9 }
 0x52e   : > { %2654 = vmatpush.msrb.mxu1 %v4391_v25  ;;  %2687 = vmatpush.msrb.mxu3 %v4360_v29  ;;  %v2528_v25 = vld [vmem:[#allocation4 + $0xd0] sm:$0xff] }
 0x530   : > { %2655 = vmatpush.msrb.mxu1 %v4173_v1  ;;  %2688 = vmatpush.msrb.mxu3 %v2070_v20 }
 0x532   : > { %v1988_v3 = vpop.permute.xlu0 %1987  ;;  %v2382_v39 = vpop.permute.xlu1 %2381  ;;  %v2546_v18 = vld [vmem:[#allocation4 + $0x160] sm:$0xff]  ;;  %2656 = vmatpush.msrb.mxu1 %v4215_v4  ;;  %v2540_v4 = vld [vmem:[#allocation4 + $0x130] sm:$0xff] }
 0x533   : > { %v2228_v56 = vpop.permute.xlu2 %2227  ;;  %v1996_v43 = vsel %vm327_vm4, %v4321_v60, %v1988_v3  ;;  %2020 = vst.msk [vmem:[#allocation4 + $0x118] sm:$0xff] %vm668_vm15, %v1988_v3  ;;  %2746 = vmatpush.msra.mxu2 %v2546_v18  ;;  %v2394_v1 = vsel %vm382_vm8, %v4253_v61, %v2382_v39  ;;  %v4516_v60 = vperm.slane %v4435_v36, 1  ;;  %v2510_v36 = vld [vmem:[#allocation4 + $0x40] sm:$0xff]  ;;  %v2579_v3 = vld [vmem:[#allocation4 + $0x268] sm:$0xff] }
 0x534   : > { %v4507_v52 = vsel %vm360_vm2, %v4316_v26, %v2228_v56  ;;  %2260 = vst.msk [vmem:[#allocation4 + $0x238] sm:$0xff] %vm668_vm15, %v2228_v56  ;;  %2657 = vmatpush.msrb.mxu1 %v4365_v37  ;;  %2689 = vmatpush.msrb.mxu3 %v1996_v43  ;;  %v2522_v44 = vld [vmem:[#allocation4 + $0xa0] sm:$0xff] }
 0x535   : > { %2747 = vmatpush.msra.mxu2 %v2543_v10  ;;  %2417 = vst.msk [vmem:[#allocation4 + $0x2e0] sm:$0xff] %vm668_vm15, %v2382_v39  ;;  %v2576_v39 = vld [vmem:[#allocation4 + $0x250] sm:$0xff] }
 0x536   : > { %2658 = vmatpush.msrb.mxu1 %v4407_v12  ;;  %2690 = vmatpush.msrb.mxu3 %v4412_v38 }
 0x537   : > { %2748 = vmatpush.msra.mxu2 %v2540_v4 }
 0x538   : > { %2659 = vmatpush.msrb.mxu1 %v4236_v30  ;;  %2691 = vmatpush.msrb.mxu3 %v4381_v34  ;;  %v2531_v34 = vld [vmem:[#allocation4 + $0xe8] sm:$0xff] }
 0x53a   : > { %v2388_v61 = vpop.permute.xlu0 %2387  ;;  %v1908_v26 = vpop.permute.xlu1 %1907  ;;  %v2537_v29 = vld [vmem:[#allocation4 + $0x118] sm:$0xff]  ;;  %2660 = vmatpush.msrb.mxu1 %v4131_v16  ;;  %2692 = vmatpush.msrb.mxu3 %v4416_v17  ;;  %v2534_v16 = vld [vmem:[#allocation4 + $0x100] sm:$0xff] }
 0x53b   : > { %v2210_v37 = vpop.permute.xlu2 %2209  ;;  %v2396_v49 = vsel %vm382_vm8, %v4437_v46, %v2388_v61  ;;  %2420 = vst.msk [vmem:[#allocation4 + $0x2f8] sm:$0xff] %vm668_vm15, %v2388_v61  ;;  %v1916_v2 = vsel %vm316_vm6, %v4419_v40, %v1908_v26  ;;  %2749 = vmatpush.msra.mxu2 %v2537_v29  ;;  %2661 = vmatmul.f32.vlgmr.msrb.gmra.mxu1 %v4516_v60  ;;  %v2573_v18 = vld [vmem:[#allocation4 + $0x238] sm:$0xff] }
 0x53c   : > { %v4531_v30 = vsel %vm360_vm2, %v4206_v51, %v2210_v37  ;;  %2251 = vst.msk [vmem:[#allocation4 + $0x1f0] sm:$0xff] %vm668_vm15, %v2210_v37  ;;  %2693 = vmatpush.msrb.mxu3 %v1916_v2  ;;  %2705 = vmatpush.msra.mxu0 %v2396_v49  ;;  %v2594_v14 = vld [vmem:[#allocation4 + $0x2e0] sm:$0xff] }
 0x53d   : > { %2750 = vmatpush.msra.mxu2 %v2534_v16  ;;  %1940 = vst.msk [vmem:[#allocation4 + $0xb8] sm:$0xff] %vm668_vm15, %v1908_v26 }
 0x53e   : > { %2694 = vmatpush.msrb.mxu3 %v1914_v21  ;;  %2706 = vmatpush.msra.mxu0 %v2394_v1  ;;  %v2582_v21 = vld [vmem:[#allocation4 + $0x280] sm:$0xff] }
 0x53f   : > { %2751 = vmatpush.msra.mxu2 %v2531_v34 }
 0x540   : > { %2695 = vmatpush.msrb.mxu3 %v4478_v0  ;;  %2707 = vmatpush.msra.mxu0 %v4468_v15 }
 0x541   : > { %2752 = vmatpush.msra.mxu2 %v2528_v25 }
 0x542   : > { %v2216_v51 = vpop.permute.xlu0 %2215  ;;  %v2222_v63 = vpop.permute.xlu1 %2221  ;;  %2696 = vmatpush.msrb.mxu3 %v4399_v59  ;;  %2708 = vmatpush.msra.mxu0 %v4451_v23  ;;  %v2509_v59 = vld [vmem:[#allocation4 + $0x38] sm:$0xff]  ;;  %v2606_v23 = vld [vmem:[#allocation4 + $0x340] sm:$0xff] }
 0x543   : > { %v2142_v45 = vpop.permute.xlu2 %2141  ;;  %v2232_v12 = vsel %vm360_vm2, %v4169_v50, %v2216_v51  ;;  %2254 = vst.msk [vmem:[#allocation4 + $0x208] sm:$0xff] %vm668_vm15, %v2216_v51  ;;  %v2234_v17 = vsel %vm360_vm2, %v4385_v62, %v2222_v63  ;;  %v2506_v50 = vld [vmem:[#allocation4 + $0x20] sm:$0xff]  ;;  %v2597_v58 = vld [vmem:[#allocation4 + $0x2f8] sm:$0xff] }
 0x544   : > { %v2154_v38 = vsel %vm349_vm0, %v4402_v33, %v2142_v45  ;;  %2177 = vst.msk [vmem:[#allocation4 + $0x1c0] sm:$0xff] %vm668_vm15, %v2142_v45  ;;  %2697 = vmatpush.msrb.mxu3 %v2512_v32  ;;  %2709 = vmatpush.msra.mxu0 %v4491_v28  ;;  %v2525_v40 = vld [vmem:[#allocation4 + $0xb8] sm:$0xff]  ;;  %v2503_v33 = vld [vmem:[#allocation4 + $0x8] sm:$0xff] }
 0x545   : > { %2257 = vst.msk [vmem:[#allocation4 + $0x220] sm:$0xff] %vm668_vm15, %v2222_v63  ;;  %2753 = vmatpush.msra.mxu2 %v2525_v40  ;;  %v2585_v28 = vld [vmem:[#allocation4 + $0x298] sm:$0xff] }
 0x546   : > { %2698 = vmatpush.msrb.mxu3 %v2509_v59  ;;  %2710 = vmatpush.msra.mxu0 %v4427_v19 }
 0x547   : > { %2754 = vmatpush.msra.mxu2 %v2522_v44 }
 0x548   : > { %2699 = vmatpush.msrb.mxu3 %v2506_v50  ;;  %2711 = vmatpush.msra.mxu0 %v4395_v55  ;;  %v2516_v55 = vld [vmem:[#allocation4 + $0x70] sm:$0xff] }
 0x549   : > { %2755 = vmatpush.msra.mxu2 %v2519_v35 }
 0x54a   : > { %v2468_v57 = vpop.permute.xlu0 %2467  ;;  %v2456_v62 = vpop.permute.xlu1 %2455  ;;  %2700 = vmatpush.msrb.mxu3 %v2503_v33  ;;  %2712 = vmatpush.msra.mxu0 %v4348_v13  ;;  %v2567_v43 = vld [vmem:[#allocation4 + $0x208] sm:$0xff] }
 0x54b   : > { %v2476_v20 = vsel %vm393_vm3, %v4371_v5, %v2468_v57  ;;  %2500 = vst.msk [vmem:[#allocation4 + $0x358] sm:$0xff] %vm668_vm15, %v2468_v57  ;;  %v2472_v19 = vsel %vm393_vm3, %v4225_v24, %v2456_v62  ;;  %2701 = vmatmul.f32.vlgmr.msrb.gmra.mxu3 %v4460_v47  ;;  %2756 = vmatpush.msra.mxu2 %v2516_v55  ;;  %v2513_v5 = vld [vmem:[#allocation4 + $0x58] sm:$0xff]  ;;  %v2558_v1 = vld [vmem:[#allocation4 + $0x1c0] sm:$0xff]  ;;  %v2614_v29 = vpop.permute.xlu2 %2613 }
 0x54c   : > { %2737 = vmatpush.msra.mxu1 %v2476_v20  ;;  %2713 = vmatpush.msra.mxu0 %v4507_v52  ;;  %2494 = vst.msk [vmem:[#allocation4 + $0x328] sm:$0xff] %vm668_vm15, %v2456_v62  ;;  %v2570_v56 = vld [vmem:[#allocation4 + $0x220] sm:$0xff]  ;;  %v2564_v52 = vld [vmem:[#allocation4 + $0x1f0] sm:$0xff]  ;;  %v2616_v49 = vperm.slane %v2614_v29, 0 }
 0x54d   : > { %2757 = vmatpush.msra.mxu2 %v2513_v5 }
 0x54e   : > { %2738 = vmatpush.msra.mxu1 %v4474_v11  ;;  %2714 = vmatpush.msra.mxu0 %v2234_v17 }
 0x54f   : > { %2758 = vmatpush.msra.mxu2 %v2510_v36 }
 0x550   : > { %2739 = vmatpush.msra.mxu1 %v2472_v19  ;;  %2715 = vmatpush.msra.mxu0 %v2232_v12 }
 0x551   : > { %2759 = vmatpush.msra.mxu2 %v2507_v42 }
 0x552   : > { %v2450_v24 = vpop.permute.xlu0 %2449  ;;  %v2148_v13 = vpop.permute.xlu1 %2147  ;;  %v2609_v46 = vld [vmem:[#allocation4 + $0x358] sm:$0xff]  ;;  %2716 = vmatpush.msra.mxu0 %v4531_v30 }
 0x553   : > { %v2470_v27 = vsel %vm393_vm3, %v4650_v22, %v2450_v24  ;;  %2491 = vst.msk [vmem:[#allocation4 + $0x310] sm:$0xff] %vm668_vm15, %v2450_v24  ;;  %v2156_v53 = vsel %vm349_vm0, %v4352_v8, %v2148_v13  ;;  %2797 = vmatpush.msra.mxu3 %v2609_v46  ;;  %2760 = vmatpush.msra.mxu2 %v2504_v7  ;;  %v2603_v15 = vld [vmem:[#allocation4 + $0x328] sm:$0xff] }
 0x554   : > { %2740 = vmatpush.msra.mxu1 %v2470_v27  ;;  %2717 = vmatpush.msra.mxu0 %v2156_v53  ;;  %2180 = vst.msk [vmem:[#allocation4 + $0x1d8] sm:$0xff] %vm668_vm15, %v2148_v13  ;;  %v2591_v8 = vld [vmem:[#allocation4 + $0x2c8] sm:$0xff] }
 0x555   : > { %2798 = vmatpush.msra.mxu3 %v2606_v23  ;;  %2761 = vmatmul.f32.vlgmr.msra.gmra.mxu2 %v4460_v47 }
 0x556   : > { %2765 = vmatpush.msrb.mxu1 %v2597_v58  ;;  %2718 = vmatpush.msra.mxu0 %v2154_v38 }
 0x557   : > { %2799 = vmatpush.msra.mxu3 %v2603_v15  ;;  %2904 = vmatmul.msk.f32.vlgmr.msra.gmra.mxu1 %vm1463_vm10, %v4441_v31 }
 0x558   : > { %2766 = vmatpush.msrb.mxu1 %v2594_v14 }
 0x55a   : > { %v2136_v11 = vpop.permute.xlu0 %2135  ;;  %v2130_v0 = vpop.permute.xlu1 %2129  ;;  %v2600_v41 = vld [vmem:[#allocation4 + $0x310] sm:$0xff]  ;;  %2767 = vmatpush.msrb.mxu1 %v2591_v8 }
 0x55b   : > { %v2152_v9 = vsel %vm349_vm0, %v4651_v54, %v2136_v11  ;;  %2174 = vst.msk [vmem:[#allocation4 + $0x1a8] sm:$0xff] %vm668_vm15, %v2136_v11  ;;  %v2150_v47 = vsel %vm349_vm0, %v4652_v6, %v2130_v0  ;;  %2800 = vmatpush.msra.mxu3 %v2600_v41  ;;  %vm2814_vm0 = vcmask 1041408  }
 0x55c   : > { %2768 = vmatpush.msrb.mxu1 %v2588_v48  ;;  %2719 = vmatpush.msra.mxu0 %v2152_v9  ;;  %2171 = vst.msk [vmem:[#allocation4 + $0x190] sm:$0xff] %vm668_vm15, %v2130_v0 }
 0x55d   : > { %2905 = vmatmul.msk.f32.vlgmr.msra.gmra.mxu3 %vm1463_vm10, %v4441_v31  ;;  %v2561_v31 = vld [vmem:[#allocation4 + $0x1d8] sm:$0xff] }
 0x55e   : > { %2769 = vmatpush.msrb.mxu1 %v2585_v28  ;;  %2720 = vmatpush.msra.mxu0 %v2150_v47 }
 0x55f   : > { %2721 = vmatmul.f32.vlgmr.msra.gmra.mxu0 %v4516_v60 }
 0x560   : > { %2770 = vmatpush.msrb.mxu1 %v2582_v21 }
 0x562   : > { %2771 = vmatpush.msrb.mxu1 %v2579_v3  ;;  %v2555_v10 = vld [vmem:[#allocation4 + $0x1a8] sm:$0xff] }
 0x563   : > { %v2552_v4 = vld [vmem:[#allocation4 + $0x190] sm:$0xff] }
 0x564   : > { %2772 = vmatpush.msrb.mxu1 %v2576_v39 }
 0x566   : > { %2773 = vmatpush.msrb.mxu1 %v2573_v18 }
 0x568   : > { %2774 = vmatpush.msrb.mxu1 %v2570_v56 }
 0x56a   : > { %2775 = vmatpush.msrb.mxu1 %v2567_v43 }
 0x56c   : > { %2776 = vmatpush.msrb.mxu1 %v2564_v52 }
 0x56e   : > { %2777 = vmatpush.msrb.mxu1 %v2561_v31 }
 0x570   : > { %2778 = vmatpush.msrb.mxu1 %v2558_v1 }
 0x572   : > { %2779 = vmatpush.msrb.mxu1 %v2555_v10 }
 0x574   : > { %2780 = vmatpush.msrb.mxu1 %v2552_v4 }
 0x575   : > { %2781 = vmatmul.f32.vlgmr.msrb.gmra.mxu1 %v4516_v60 }
 0x599   : > { %v2682_v2 = vpop.f32.mrf.mxu2 }
 0x5a0   : > { %v2642_v61 = vpop.f32.mrf.mxu0 }
 0x5a1   : > { %v2643_v51 = vadd.f32 %v2642_v61, %v2616_v49 }
 0x5b8   : > { %v2662_v26 = vpop.f32.mrf.mxu1 }
 0x5b9   : > { %v2663_v12 = vadd.f32 %v2662_v26, %v2643_v51 }
 0x5bb   : > { %v2683_v59 = vadd.f32 %v2682_v2, %v2663_v12 }
 0x5ce   : > { %v2702_v37 = vpop.f32.mrf.mxu3 }
 0x5cf   : > { %v2703_v16 = vadd.f32 %v2702_v37, %v2616_v49 }
 0x5d4   : > { %v2742_v25 = vpop.f32.mrf.mxu1 }
 0x5d8   : > { %v2762_v63 = vpop.f32.mrf.mxu2 }
 0x5d9   : > { %v2763_v32 = vadd.f32 %v2762_v63, %v2616_v49 }
 0x5dc   : > { %v2722_v30 = vpop.f32.mrf.mxu0 }
 0x5dd   : > { %v2723_v34 = vadd.f32 %v2722_v30, %v2703_v16 }
 0x5df   : > { %v2743_v45 = vadd.f32 %v2742_v25, %v2723_v34 }
 0x5e0   : > { %v2802_v17 = vpop.f32.mrf.mxu3 }
 0x5e1   : > { %2931 = vtanh.f32 %v2743_v45 }
 0x5e7   : > { %v2932_v50 = vpop.eup %2931 }
 0x5e8   : > { %v2811_v44 = vrot.slane %v2932_v50, 7 }
 0x5f2   : > { %v2782_v38 = vpop.f32.mrf.mxu1 }
 0x5f3   : > { %v2783_v60 = vadd.f32 %v2782_v38, %v2763_v32 }
 0x5f5   : > { %v2803_v40 = vadd.f32 %v2802_v17, %v2783_v60 }
 0x5f7   : > { %2933 = vtanh.f32 %v2803_v40 }
 0x5f8   : > { %2935 = vtanh.f32 %v2683_v59 }
 0x5fd   : > { %v2934_v33 = vpop.eup %2933 }
 0x5fe   : > { %v2936_v57 = vpop.eup %2935  ;;  %v2812_v62 = vrot.slane %v2934_v33, 6 }
 0x5ff   : > { %v2813_v35 = vsel %vm446_vm7, %v2936_v57, %v2811_v44 }
 0x600   : > { %v2815_v20 = vsel %vm2814_vm0, %v2813_v35, %v2812_v62 }
 0x601   : > { %2817 = vst.msk [vmem:[%s302_s16] sm:$0x7] %vm3038_vm1, %v2815_v20 }
 0x602 PF: > { %s20_s29 = sadd.s32 1, %s2943_s29  }
 0x603   : > { %p17_p4 = scmp.ge.s32.totalorder %s20_s29, 4  }
 0x605   :  { %19 = sbr.rel (!%p17_p4) target bundleno = 3 (0x3), region = 90 }

</bundles_post_ra>
